<compile_context>
chip_gen: v7x
topology: tpu7x:2x2x1
jax: 0.10.0
libtpu: 0.0.40
codegen_flags: <defaults>
</compile_context>

<pallas_src>
import functools

import jax
import jax.numpy as jnp
from jax.experimental import pallas as pl
from jax.experimental.pallas import tpu as pltpu


def encoder_layer_kernel(
    x_ref, xq_ref, npm_ref, amask_ref,
    wq_ref, bq_ref, wk_ref, bk_ref, wv_ref, bv_ref,
    wfc_ref, bfc_ref, g1_ref, be1_ref,
    w1_ref, b1_ref, w2_ref, b2_ref, g2_ref, be2_ref,
    out_ref, *opt_attn_ref, n_head, d_k, d_v):
  """One grid step == (batch element, query tile)."""
  attn_ref = opt_attn_ref[0] if opt_attn_ref else None

  x = x_ref[0]          # (L, D)        bf16, full sequence (for K/V)
  xq = xq_ref[0]        # (block_q, D)  bf16, query tile
  npm = npm_ref[0]      # (block_q, 1)  f32  non-pad mask (1 = keep)
  amask = amask_ref[0]  # (block_q, L)  f32  attention mask (1 = masked out)

  # Additive mask computed once (hoisted out of the head loop); finite -1e30 so
  # fully-masked rows don't turn into NaN.
  mask_add = jnp.where(amask > 0.5, jnp.float32(-1e30), jnp.float32(0.0))

  # ---- QKV projections: bf16 operands on the MXU, f32 accumulation ----
  k = jnp.dot(x, wk_ref[...], preferred_element_type=jnp.float32) + bk_ref[...]
  v = jnp.dot(x, wv_ref[...], preferred_element_type=jnp.float32) + bv_ref[...]
  q = jnp.dot(xq, wq_ref[...], preferred_element_type=jnp.float32) + bq_ref[...]

  inv_temp = jnp.float32(1.0 / (float(d_k) ** 0.5))
  q_bf = (q * inv_temp).astype(jnp.bfloat16)   # fold 1/sqrt(d_k) into Q
  k_bf = k.astype(jnp.bfloat16)
  v_bf = v.astype(jnp.bfloat16)

  block_q = xq.shape[0]
  d_model = out_ref.shape[-1]

  # Fused output projection: accumulate head_out @ wfc[h*d_v:(h+1)*d_v, :]
  # directly into a (block_q, D) f32 accumulator — no lane-axis concatenate.
  acc = jnp.zeros((block_q, d_model), jnp.float32)

  for h in range(n_head):  # static unroll over heads
    qh = q_bf[:, h * d_k:(h + 1) * d_k]
    kh = k_bf[:, h * d_k:(h + 1) * d_k]
    vh = v_bf[:, h * d_v:(h + 1) * d_v]

    scores = jnp.dot(qh, kh.T, preferred_element_type=jnp.float32) + mask_add
    m = jnp.max(scores, axis=-1, keepdims=True)          # f32 softmax stats
    e = jnp.exp(scores - m)
    denom = jnp.sum(e, axis=-1, keepdims=True)
    attn = e * pl.reciprocal(denom, approx=True)          # EUP, ~free

    if attn_ref is not None:
      attn_ref[h, 0] = attn.astype(attn_ref.dtype)

    head_out = jnp.dot(attn.astype(jnp.bfloat16), vh,
                       preferred_element_type=jnp.float32)
    acc = acc + jnp.dot(head_out.astype(jnp.bfloat16),
                        wfc_ref[h * d_v:(h + 1) * d_v, :],
                        preferred_element_type=jnp.float32)

  # residual + LayerNorm 1 (eps=1e-5, biased variance, like torch.nn.LayerNorm)
  y = acc + bfc_ref[...] + xq.astype(jnp.float32)
  mean = jnp.mean(y, axis=-1, keepdims=True)
  var = jnp.mean((y - mean) ** 2, axis=-1, keepdims=True)
  y = (y - mean) * jax.lax.rsqrt(var + 1e-5) * g1_ref[...] + be1_ref[...]

  # enc_output *= non_pad_mask
  y = y * npm

  # ---- position-wise FFN (1x1 convs == per-position linears) ----
  h1 = jnp.dot(y.astype(jnp.bfloat16), w1_ref[...],
               preferred_element_type=jnp.float32) + b1_ref[...]
  h1 = jnp.maximum(h1, 0.0)
  h2 = jnp.dot(h1.astype(jnp.bfloat16), w2_ref[...],
               preferred_element_type=jnp.float32) + b2_ref[...]
  z = h2 + y
  mean = jnp.mean(z, axis=-1, keepdims=True)
  var = jnp.mean((z - mean) ** 2, axis=-1, keepdims=True)
  z = (z - mean) * jax.lax.rsqrt(var + 1e-5) * g2_ref[...] + be2_ref[...]

  # enc_output *= non_pad_mask
  z = z * npm
  out_ref[0] = z.astype(out_ref.dtype)


def encoder_layer(params, enc_input, non_pad_mask, slf_attn_mask, *,
                  n_head, d_k, d_v, block_q=None, return_attn=True):
  B, L, D = enc_input.shape
  n_dk, n_dv = n_head * d_k, n_head * d_v
  d_inner = params["w1"].shape[1]

  # Keep the M-tile large (>=256 when L allows) for the 256-wide MXU on v6e/v7x.
  if block_q is None:
    block_q = min(L, 256)
  assert L % block_q == 0, "L must be divisible by block_q"
  n_qb = L // block_q

  # bf16 activations + matmul weights; biases / LayerNorm params stay f32.
  bf16 = jnp.bfloat16
  x_bf = enc_input.astype(bf16)
  wq, wk, wv = params["wq"].astype(bf16), params["wk"].astype(bf16), params["wv"].astype(bf16)
  wfc, w1, w2 = params["wfc"].astype(bf16), params["w1"].astype(bf16), params["w2"].astype(bf16)

  kernel = functools.partial(encoder_layer_kernel,
                             n_head=n_head, d_k=d_k, d_v=d_v)

  def const_spec(shape):
    nd = len(shape)
    return pl.BlockSpec(shape, lambda b, qb: (0,) * nd)

  in_specs = [
      pl.BlockSpec((1, L, D), lambda b, qb: (b, 0, 0)),         # full seq (K/V)
      pl.BlockSpec((1, block_q, D), lambda b, qb: (b, qb, 0)),  # query tile
      pl.BlockSpec((1, block_q, 1), lambda b, qb: (b, qb, 0)),  # non-pad mask tile
      pl.BlockSpec((1, block_q, L), lambda b, qb: (b, qb, 0)),  # attn-mask tile
      const_spec((D, n_dk)), const_spec((1, n_dk)),             # w_qs
      const_spec((D, n_dk)), const_spec((1, n_dk)),             # w_ks
      const_spec((D, n_dv)), const_spec((1, n_dv)),             # w_vs
      const_spec((n_dv, D)), const_spec((1, D)),                # fc
      const_spec((1, D)), const_spec((1, D)),                   # layer_norm 1
      const_spec((D, d_inner)), const_spec((1, d_inner)),       # ffn w_1 (1x1 conv)
      const_spec((d_inner, D)), const_spec((1, D)),             # ffn w_2 (1x1 conv)
      const_spec((1, D)), const_spec((1, D)),                   # layer_norm 2
  ]

  out_specs = [pl.BlockSpec((1, block_q, D), lambda b, qb: (b, qb, 0))]
  out_shape = [jax.ShapeDtypeStruct((B, L, D), enc_input.dtype)]
  if return_attn:
    out_specs.append(pl.BlockSpec((n_head, 1, block_q, L), lambda b, qb: (0, b, qb, 0)))
    out_shape.append(jax.ShapeDtypeStruct((n_head, B, L, L), jnp.float32))

  outs = pl.pallas_call(
      kernel,
      out_shape=tuple(out_shape),
      grid_spec=pltpu.PrefetchScalarGridSpec(
          num_scalar_prefetch=0,
          grid=(B, n_qb),
          in_specs=in_specs,
          out_specs=tuple(out_specs)),
      compiler_params=pltpu.CompilerParams(
          dimension_semantics=("parallel", "parallel"),
          # Fits v7x's 64 MiB VMEM (and raises the smaller v5e/v6e defaults).
          vmem_limit_bytes=48 * 1024 * 1024),
  )(x_bf, x_bf,
    non_pad_mask.astype(jnp.float32), slf_attn_mask.astype(jnp.float32),
    wq, params["bq"], wk, params["bk"], wv, params["bv"],
    wfc, params["bfc"], params["g1"], params["be1"],
    w1, params["b1"], w2, params["b2"], params["g2"], params["be2"])

  if return_attn:
    enc_out, attn = outs
    # PyTorch returns attn with shape (n_head * B, L, L), head-major ordering.
    return enc_out, attn.reshape(n_head * B, L, L)
  (enc_out,) = outs
  return enc_out, None


# -------------------- pure-JAX reference (for correctness check) --------------------
def _layer_norm(x, g, b, eps=1e-5):
  m = jnp.mean(x, axis=-1, keepdims=True)
  v = jnp.mean((x - m) ** 2, axis=-1, keepdims=True)
  return (x - m) * jax.lax.rsqrt(v + eps) * g + b


def encoder_layer_ref(params, x, npm, amask, *, n_head, d_k, d_v):
  B, L, D = x.shape
  q = (x @ params["wq"] + params["bq"]).reshape(B, L, n_head, d_k)
  k = (x @ params["wk"] + params["bk"]).reshape(B, L, n_head, d_k)
  v = (x @ params["wv"] + params["bv"]).reshape(B, L, n_head, d_v)
  q = jnp.transpose(q, (2, 0, 1, 3)).reshape(n_head * B, L, d_k)
  k = jnp.transpose(k, (2, 0, 1, 3)).reshape(n_head * B, L, d_k)
  v = jnp.transpose(v, (2, 0, 1, 3)).reshape(n_head * B, L, d_v)
  mask = jnp.tile(amask, (n_head, 1, 1)) > 0.5
  scores = jnp.einsum("nld,nmd->nlm", q, k) / jnp.sqrt(jnp.float32(d_k))
  scores = jnp.where(mask, -jnp.inf, scores)
  attn = jax.nn.softmax(scores, axis=-1)
  out = jnp.einsum("nlm,nmd->nld", attn, v)
  out = out.reshape(n_head, B, L, d_v).transpose(1, 2, 0, 3).reshape(B, L, n_head * d_v)
  out = out @ params["wfc"] + params["bfc"]
  y = _layer_norm(out + x, params["g1"], params["be1"])
  y = y * npm
  h1 = jax.nn.relu(y @ params["w1"] + params["b1"])
  h2 = h1 @ params["w2"] + params["b2"]
  z = _layer_norm(h2 + y, params["g2"], params["be2"])
  z = z * npm
  return z, attn


# -------------------- parameter init & demo --------------------
def make_params(key, d_model, d_inner, n_head, d_k, d_v):
  ks = jax.random.split(key, 12)
  n_dk, n_dv = n_head * d_k, n_head * d_v
  norm = lambda k, shp, s: (jax.random.normal(k, shp, jnp.float32) * s)
  return {
      # linear weights stored as (in, out); biases as (1, out)
      "wq": norm(ks[0], (d_model, n_dk), 0.1), "bq": norm(ks[1], (1, n_dk), 0.02),
      "wk": norm(ks[2], (d_model, n_dk), 0.1), "bk": norm(ks[3], (1, n_dk), 0.02),
      "wv": norm(ks[4], (d_model, n_dv), 0.1), "bv": norm(ks[5], (1, n_dv), 0.02),
      "wfc": norm(ks[6], (n_dv, d_model), 0.1), "bfc": norm(ks[7], (1, d_model), 0.02),
      "g1": jnp.ones((1, d_model), jnp.float32), "be1": jnp.zeros((1, d_model), jnp.float32),
      "w1": norm(ks[8], (d_model, d_inner), 0.1), "b1": norm(ks[9], (1, d_inner), 0.02),
      "w2": norm(ks[10], (d_inner, d_model), 0.1), "b2": norm(ks[11], (1, d_model), 0.02),
      "g2": jnp.ones((1, d_model), jnp.float32), "be2": jnp.zeros((1, d_model), jnp.float32),
  }


if __name__ == "__main__":
  B, L = 2, 32
  d_model, d_inner, n_head, d_k, d_v = 32, 64, 4, 8, 8
  block_q = 16   # 2 query tiles per sequence -> exercises the (batch, q-tile) grid

  key = jax.random.PRNGKey(0)
  k_x, k_p = jax.random.split(key)
  enc_input = jax.random.normal(k_x, (B, L, d_model), jnp.float32)
  params = make_params(k_p, d_model, d_inner, n_head, d_k, d_v)

  # padding masks: sequence lengths [32, 20]
  lengths = jnp.array([32, 20], jnp.int32)
  pos = jnp.arange(L)
  non_pad_mask = (pos[None, :] < lengths[:, None]).astype(jnp.float32)[..., None]   # (B, L, 1)
  key_pad = (pos[None, :] >= lengths[:, None])                                      # (B, L)
  slf_attn_mask = jnp.broadcast_to(key_pad[:, None, :], (B, L, L)).astype(jnp.float32)

  enc_out, attn = encoder_layer(params, enc_input, non_pad_mask, slf_attn_mask,
                                n_head=n_head, d_k=d_k, d_v=d_v, block_q=block_q)
  jax.block_until_ready((enc_out, attn))

  # Also exercise the no-attn-writeback path (drops the n_head*B*L^2 HBM traffic).
  enc_out_noattn, _ = encoder_layer(params, enc_input, non_pad_mask, slf_attn_mask,
                                    n_head=n_head, d_k=d_k, d_v=d_v,
                                    block_q=block_q, return_attn=False)
  jax.block_until_ready(enc_out_noattn)

  ref_out, ref_attn = encoder_layer_ref(params, enc_input, non_pad_mask, slf_attn_mask,
                                        n_head=n_head, d_k=d_k, d_v=d_v)
  assert enc_out.shape == (B, L, d_model)
  assert attn.shape == (n_head * B, L, L)
  # bf16 matmul operands (f32 accumulation) -> slightly looser tolerance than pure f32.
  assert jnp.allclose(enc_out, ref_out, atol=2e-2, rtol=2e-2)
  assert jnp.allclose(enc_out_noattn, ref_out, atol=2e-2, rtol=2e-2)
  assert jnp.allclose(attn, ref_attn, atol=1e-2, rtol=1e-2)
  print("KERNEL_OK")
</pallas_src>

<mosaic_0001>
module attributes {stable_mosaic.version = 11 : i64} {
  func.func @encoder_layer_kernel(%arg0: i32, %arg1: i32, %arg2: memref<1x32x32xbf16, #tpu.memory_space<vmem>>, %arg3: memref<1x16x32xbf16, #tpu.memory_space<vmem>>, %arg4: memref<1x16x1xf32, #tpu.memory_space<vmem>>, %arg5: memref<1x16x32xf32, #tpu.memory_space<vmem>>, %arg6: memref<32x32xbf16, #tpu.memory_space<vmem>>, %arg7: memref<1x32xf32, #tpu.memory_space<vmem>>, %arg8: memref<32x32xbf16, #tpu.memory_space<vmem>>, %arg9: memref<1x32xf32, #tpu.memory_space<vmem>>, %arg10: memref<32x32xbf16, #tpu.memory_space<vmem>>, %arg11: memref<1x32xf32, #tpu.memory_space<vmem>>, %arg12: memref<32x32xbf16, #tpu.memory_space<vmem>>, %arg13: memref<1x32xf32, #tpu.memory_space<vmem>>, %arg14: memref<1x32xf32, #tpu.memory_space<vmem>>, %arg15: memref<1x32xf32, #tpu.memory_space<vmem>>, %arg16: memref<32x64xbf16, #tpu.memory_space<vmem>>, %arg17: memref<1x64xf32, #tpu.memory_space<vmem>>, %arg18: memref<64x32xbf16, #tpu.memory_space<vmem>>, %arg19: memref<1x32xf32, #tpu.memory_space<vmem>>, %arg20: memref<1x32xf32, #tpu.memory_space<vmem>>, %arg21: memref<1x32xf32, #tpu.memory_space<vmem>>, %arg22: memref<1x16x32xf32, #tpu.memory_space<vmem>>, %arg23: memref<4x1x16x32xf32, #tpu.memory_space<vmem>>) attributes {dimension_semantics = [#tpu.dimension_semantics<parallel>, #tpu.dimension_semantics<parallel>], iteration_bounds = array<i64: 2, 2>, scalar_prefetch = 0 : i64, scratch_operands = 0 : i64, tpu.core_type = #tpu.core_type<tc>, window_params = [{transform_indices = @transform_0, window_bounds = array<i64: 1, 32, 32>}, {transform_indices = @transform_1, window_bounds = array<i64: 1, 16, 32>}, {transform_indices = @transform_2, window_bounds = array<i64: 1, 16, 1>}, {transform_indices = @transform_3, window_bounds = array<i64: 1, 16, 32>}, {pipeline_mode = #tpu.pipeline_mode<synchronous>, transform_indices = @transform_4, window_bounds = array<i64: 32, 32>}, {pipeline_mode = #tpu.pipeline_mode<synchronous>, transform_indices = @transform_5, window_bounds = array<i64: 1, 32>}, {pipeline_mode = #tpu.pipeline_mode<synchronous>, transform_indices = @transform_6, window_bounds = array<i64: 32, 32>}, {pipeline_mode = #tpu.pipeline_mode<synchronous>, transform_indices = @transform_7, window_bounds = array<i64: 1, 32>}, {pipeline_mode = #tpu.pipeline_mode<synchronous>, transform_indices = @transform_8, window_bounds = array<i64: 32, 32>}, {pipeline_mode = #tpu.pipeline_mode<synchronous>, transform_indices = @transform_9, window_bounds = array<i64: 1, 32>}, {pipeline_mode = #tpu.pipeline_mode<synchronous>, transform_indices = @transform_10, window_bounds = array<i64: 32, 32>}, {pipeline_mode = #tpu.pipeline_mode<synchronous>, transform_indices = @transform_11, window_bounds = array<i64: 1, 32>}, {pipeline_mode = #tpu.pipeline_mode<synchronous>, transform_indices = @transform_12, window_bounds = array<i64: 1, 32>}, {pipeline_mode = #tpu.pipeline_mode<synchronous>, transform_indices = @transform_13, window_bounds = array<i64: 1, 32>}, {pipeline_mode = #tpu.pipeline_mode<synchronous>, transform_indices = @transform_14, window_bounds = array<i64: 32, 64>}, {pipeline_mode = #tpu.pipeline_mode<synchronous>, transform_indices = @transform_15, window_bounds = array<i64: 1, 64>}, {pipeline_mode = #tpu.pipeline_mode<synchronous>, transform_indices = @transform_16, window_bounds = array<i64: 64, 32>}, {pipeline_mode = #tpu.pipeline_mode<synchronous>, transform_indices = @transform_17, window_bounds = array<i64: 1, 32>}, {pipeline_mode = #tpu.pipeline_mode<synchronous>, transform_indices = @transform_18, window_bounds = array<i64: 1, 32>}, {pipeline_mode = #tpu.pipeline_mode<synchronous>, transform_indices = @transform_19, window_bounds = array<i64: 1, 32>}, {transform_indices = @transform_20, window_bounds = array<i64: 1, 16, 32>}, {transform_indices = @transform_21, window_bounds = array<i64: 4, 1, 16, 32>}]} {
    %c0 = arith.constant 0 : index
    %c0_0 = arith.constant 0 : index
    %c0_1 = arith.constant 0 : index
    %0 = vector.load %arg2[%c0, %c0_0, %c0_1] : memref<1x32x32xbf16, #tpu.memory_space<vmem>>, vector<1x32x32xbf16>
    %1 = vector.shape_cast %0 : vector<1x32x32xbf16> to vector<32x32xbf16>
    %c0_2 = arith.constant 0 : index
    %c0_3 = arith.constant 0 : index
    %c0_4 = arith.constant 0 : index
    %2 = vector.load %arg3[%c0_2, %c0_3, %c0_4] : memref<1x16x32xbf16, #tpu.memory_space<vmem>>, vector<1x16x32xbf16>
    %3 = vector.shape_cast %2 : vector<1x16x32xbf16> to vector<16x32xbf16>
    %c0_5 = arith.constant 0 : index
    %c0_6 = arith.constant 0 : index
    %c0_7 = arith.constant 0 : index
    %4 = vector.load %arg4[%c0_5, %c0_6, %c0_7] : memref<1x16x1xf32, #tpu.memory_space<vmem>>, vector<1x16x1xf32>
    %5 = vector.shape_cast %4 : vector<1x16x1xf32> to vector<16x1xf32>
    %c0_8 = arith.constant 0 : index
    %c0_9 = arith.constant 0 : index
    %c0_10 = arith.constant 0 : index
    %6 = vector.load %arg5[%c0_8, %c0_9, %c0_10] : memref<1x16x32xf32, #tpu.memory_space<vmem>>, vector<1x16x32xf32>
    %7 = vector.shape_cast %6 : vector<1x16x32xf32> to vector<16x32xf32>
    %cst = arith.constant 5.000000e-01 : f32
    %8 = vector.broadcast %cst : f32 to vector<16x32xf32>
    %9 = arith.cmpf ogt, %7, %8 : vector<16x32xf32>
    %cst_11 = arith.constant -1.000000e+30 : f32
    %cst_12 = arith.constant 0.000000e+00 : f32
    %10 = vector.broadcast %cst_11 : f32 to vector<16x32xf32>
    %11 = vector.broadcast %cst_12 : f32 to vector<16x32xf32>
    %12 = arith.select %9, %10, %11 : vector<16x32xi1>, vector<16x32xf32>
    %c0_13 = arith.constant 0 : index
    %c0_14 = arith.constant 0 : index
    %13 = vector.load %arg8[%c0_13, %c0_14] : memref<32x32xbf16, #tpu.memory_space<vmem>>, vector<32x32xbf16>
    %cst_15 = arith.constant dense<0.000000e+00> : vector<32x32xf32>
    %14 = tpu.matmul %1, %13, %cst_15 {dimension_numbers = #tpu.dot_dimension_numbers<[1], [0], [0], [1], [0, 0, 1, 1], [], []>} : vector<32x32xbf16>, vector<32x32xbf16>, vector<32x32xf32> -> vector<32x32xf32>
    %c0_16 = arith.constant 0 : index
    %c0_17 = arith.constant 0 : index
    %15 = vector.load %arg9[%c0_16, %c0_17] : memref<1x32xf32, #tpu.memory_space<vmem>>, vector<1x32xf32>
    %16 = vector.broadcast %15 : vector<1x32xf32> to vector<32x32xf32>
    %17 = arith.addf %14, %16 : vector<32x32xf32>
    %c0_18 = arith.constant 0 : index
    %c0_19 = arith.constant 0 : index
    %18 = vector.load %arg10[%c0_18, %c0_19] : memref<32x32xbf16, #tpu.memory_space<vmem>>, vector<32x32xbf16>
    %cst_20 = arith.constant dense<0.000000e+00> : vector<32x32xf32>
    %19 = tpu.matmul %1, %18, %cst_20 {dimension_numbers = #tpu.dot_dimension_numbers<[1], [0], [0], [1], [0, 0, 1, 1], [], []>} : vector<32x32xbf16>, vector<32x32xbf16>, vector<32x32xf32> -> vector<32x32xf32>
    %c0_21 = arith.constant 0 : index
    %c0_22 = arith.constant 0 : index
    %20 = vector.load %arg11[%c0_21, %c0_22] : memref<1x32xf32, #tpu.memory_space<vmem>>, vector<1x32xf32>
    %21 = vector.broadcast %20 : vector<1x32xf32> to vector<32x32xf32>
    %22 = arith.addf %19, %21 : vector<32x32xf32>
    %c0_23 = arith.constant 0 : index
    %c0_24 = arith.constant 0 : index
    %23 = vector.load %arg6[%c0_23, %c0_24] : memref<32x32xbf16, #tpu.memory_space<vmem>>, vector<32x32xbf16>
    %cst_25 = arith.constant dense<0.000000e+00> : vector<16x32xf32>
    %24 = tpu.matmul %3, %23, %cst_25 {dimension_numbers = #tpu.dot_dimension_numbers<[1], [0], [0], [1], [0, 0, 1, 1], [], []>} : vector<16x32xbf16>, vector<32x32xbf16>, vector<16x32xf32> -> vector<16x32xf32>
    %c0_26 = arith.constant 0 : index
    %c0_27 = arith.constant 0 : index
    %25 = vector.load %arg7[%c0_26, %c0_27] : memref<1x32xf32, #tpu.memory_space<vmem>>, vector<1x32xf32>
    %26 = vector.broadcast %25 : vector<1x32xf32> to vector<16x32xf32>
    %27 = arith.addf %24, %26 : vector<16x32xf32>
    %cst_28 = arith.constant 0.353553385 : f32
    %28 = vector.broadcast %cst_28 : f32 to vector<16x32xf32>
    %29 = arith.mulf %27, %28 : vector<16x32xf32>
    %30 = arith.truncf %29 : vector<16x32xf32> to vector<16x32xbf16>
    %31 = arith.truncf %17 : vector<32x32xf32> to vector<32x32xbf16>
    %32 = arith.truncf %22 : vector<32x32xf32> to vector<32x32xbf16>
    %cst_29 = arith.constant 0.000000e+00 : f32
    %33 = vector.broadcast %cst_29 : f32 to vector<16x32xf32>
    %34 = vector.extract_strided_slice %30 {offsets = [0, 0], sizes = [16, 8], strides = [1, 1]} : vector<16x32xbf16> to vector<16x8xbf16>
    %35 = vector.extract_strided_slice %31 {offsets = [0, 0], sizes = [32, 8], strides = [1, 1]} : vector<32x32xbf16> to vector<32x8xbf16>
    %36 = vector.extract_strided_slice %32 {offsets = [0, 0], sizes = [32, 8], strides = [1, 1]} : vector<32x32xbf16> to vector<32x8xbf16>
    %37 = tpu.transpose %35, [1, 0] : vector<32x8xbf16> -> vector<8x32xbf16>
    %cst_30 = arith.constant dense<0.000000e+00> : vector<16x32xf32>
    %38 = tpu.matmul %34, %37, %cst_30 {dimension_numbers = #tpu.dot_dimension_numbers<[1], [0], [0], [1], [0, 0, 1, 1], [], []>} : vector<16x8xbf16>, vector<8x32xbf16>, vector<16x32xf32> -> vector<16x32xf32>
    %39 = arith.addf %38, %12 : vector<16x32xf32>
    %cst_31 = arith.constant dense<0xFF800000> : vector<16xf32>
    %40 = vector.multi_reduction <maximumf>, %39, %cst_31 [1] : vector<16x32xf32> to vector<16xf32>
    %41 = vector.shape_cast %40 : vector<16xf32> to vector<16x1xf32>
    %42 = vector.broadcast %41 : vector<16x1xf32> to vector<16x32xf32>
    %43 = arith.subf %39, %42 : vector<16x32xf32>
    %44 = math.exp %43 : vector<16x32xf32>
    %cst_32 = arith.constant dense<0.000000e+00> : vector<16xf32>
    %45 = vector.multi_reduction <add>, %44, %cst_32 [1] : vector<16x32xf32> to vector<16xf32>
    %46 = vector.shape_cast %45 : vector<16xf32> to vector<16x1xf32>
    %47 = tpu.reciprocal %46 {approx = true} : vector<16x1xf32> -> vector<16x1xf32>
    %48 = vector.broadcast %47 : vector<16x1xf32> to vector<16x32xf32>
    %49 = arith.mulf %44, %48 : vector<16x32xf32>
    %c0_33 = arith.constant 0 : index
    %c0_34 = arith.constant 0 : index
    %c0_35 = arith.constant 0 : index
    %c0_36 = arith.constant 0 : index
    %50 = vector.load %arg23[%c0_33, %c0_34, %c0_35, %c0_36] : memref<4x1x16x32xf32, #tpu.memory_space<vmem>>, vector<1x1x16x32xf32>
    %51 = vector.shape_cast %50 : vector<1x1x16x32xf32> to vector<16x32xf32>
    %52 = vector.shape_cast %49 : vector<16x32xf32> to vector<1x1x16x32xf32>
    tpu.vector_store %arg23[%c0_33, %c0_34, %c0_35, %c0_36], %52 {strides = array<i32>} : memref<4x1x16x32xf32, #tpu.memory_space<vmem>>, vector<1x1x16x32xf32>,
    %53 = arith.truncf %49 : vector<16x32xf32> to vector<16x32xbf16>
    %cst_37 = arith.constant dense<0.000000e+00> : vector<16x8xf32>
    %54 = tpu.matmul %53, %36, %cst_37 {dimension_numbers = #tpu.dot_dimension_numbers<[1], [0], [0], [1], [0, 0, 1, 1], [], []>} : vector<16x32xbf16>, vector<32x8xbf16>, vector<16x8xf32> -> vector<16x8xf32>
    %55 = arith.truncf %54 : vector<16x8xf32> to vector<16x8xbf16>
    %c0_38 = arith.constant 0 : index
    %c0_39 = arith.constant 0 : index
    %56 = vector.load %arg12[%c0_38, %c0_39] : memref<32x32xbf16, #tpu.memory_space<vmem>>, vector<8x32xbf16>
    %cst_40 = arith.constant dense<0.000000e+00> : vector<16x32xf32>
    %57 = tpu.matmul %55, %56, %cst_40 {dimension_numbers = #tpu.dot_dimension_numbers<[1], [0], [0], [1], [0, 0, 1, 1], [], []>} : vector<16x8xbf16>, vector<8x32xbf16>, vector<16x32xf32> -> vector<16x32xf32>
    %58 = arith.addf %33, %57 : vector<16x32xf32>
    %59 = vector.extract_strided_slice %30 {offsets = [0, 8], sizes = [16, 8], strides = [1, 1]} : vector<16x32xbf16> to vector<16x8xbf16>
    %60 = vector.extract_strided_slice %31 {offsets = [0, 8], sizes = [32, 8], strides = [1, 1]} : vector<32x32xbf16> to vector<32x8xbf16>
    %61 = vector.extract_strided_slice %32 {offsets = [0, 8], sizes = [32, 8], strides = [1, 1]} : vector<32x32xbf16> to vector<32x8xbf16>
    %62 = tpu.transpose %60, [1, 0] : vector<32x8xbf16> -> vector<8x32xbf16>
    %cst_41 = arith.constant dense<0.000000e+00> : vector<16x32xf32>
    %63 = tpu.matmul %59, %62, %cst_41 {dimension_numbers = #tpu.dot_dimension_numbers<[1], [0], [0], [1], [0, 0, 1, 1], [], []>} : vector<16x8xbf16>, vector<8x32xbf16>, vector<16x32xf32> -> vector<16x32xf32>
    %64 = arith.addf %63, %12 : vector<16x32xf32>
    %cst_42 = arith.constant dense<0xFF800000> : vector<16xf32>
    %65 = vector.multi_reduction <maximumf>, %64, %cst_42 [1] : vector<16x32xf32> to vector<16xf32>
    %66 = vector.shape_cast %65 : vector<16xf32> to vector<16x1xf32>
    %67 = vector.broadcast %66 : vector<16x1xf32> to vector<16x32xf32>
    %68 = arith.subf %64, %67 : vector<16x32xf32>
    %69 = math.exp %68 : vector<16x32xf32>
    %cst_43 = arith.constant dense<0.000000e+00> : vector<16xf32>
    %70 = vector.multi_reduction <add>, %69, %cst_43 [1] : vector<16x32xf32> to vector<16xf32>
    %71 = vector.shape_cast %70 : vector<16xf32> to vector<16x1xf32>
    %72 = tpu.reciprocal %71 {approx = true} : vector<16x1xf32> -> vector<16x1xf32>
    %73 = vector.broadcast %72 : vector<16x1xf32> to vector<16x32xf32>
    %74 = arith.mulf %69, %73 : vector<16x32xf32>
    %c1 = arith.constant 1 : index
    %c0_44 = arith.constant 0 : index
    %c0_45 = arith.constant 0 : index
    %c0_46 = arith.constant 0 : index
    %75 = vector.load %arg23[%c1, %c0_44, %c0_45, %c0_46] : memref<4x1x16x32xf32, #tpu.memory_space<vmem>>, vector<1x1x16x32xf32>
    %76 = vector.shape_cast %75 : vector<1x1x16x32xf32> to vector<16x32xf32>
    %77 = vector.shape_cast %74 : vector<16x32xf32> to vector<1x1x16x32xf32>
    tpu.vector_store %arg23[%c1, %c0_44, %c0_45, %c0_46], %77 {strides = array<i32>} : memref<4x1x16x32xf32, #tpu.memory_space<vmem>>, vector<1x1x16x32xf32>,
    %78 = arith.truncf %74 : vector<16x32xf32> to vector<16x32xbf16>
    %cst_47 = arith.constant dense<0.000000e+00> : vector<16x8xf32>
    %79 = tpu.matmul %78, %61, %cst_47 {dimension_numbers = #tpu.dot_dimension_numbers<[1], [0], [0], [1], [0, 0, 1, 1], [], []>} : vector<16x32xbf16>, vector<32x8xbf16>, vector<16x8xf32> -> vector<16x8xf32>
    %80 = arith.truncf %79 : vector<16x8xf32> to vector<16x8xbf16>
    %c8 = arith.constant 8 : index
    %c0_48 = arith.constant 0 : index
    %81 = vector.load %arg12[%c8, %c0_48] : memref<32x32xbf16, #tpu.memory_space<vmem>>, vector<8x32xbf16>
    %cst_49 = arith.constant dense<0.000000e+00> : vector<16x32xf32>
    %82 = tpu.matmul %80, %81, %cst_49 {dimension_numbers = #tpu.dot_dimension_numbers<[1], [0], [0], [1], [0, 0, 1, 1], [], []>} : vector<16x8xbf16>, vector<8x32xbf16>, vector<16x32xf32> -> vector<16x32xf32>
    %83 = arith.addf %58, %82 : vector<16x32xf32>
    %84 = vector.extract_strided_slice %30 {offsets = [0, 16], sizes = [16, 8], strides = [1, 1]} : vector<16x32xbf16> to vector<16x8xbf16>
    %85 = vector.extract_strided_slice %31 {offsets = [0, 16], sizes = [32, 8], strides = [1, 1]} : vector<32x32xbf16> to vector<32x8xbf16>
    %86 = vector.extract_strided_slice %32 {offsets = [0, 16], sizes = [32, 8], strides = [1, 1]} : vector<32x32xbf16> to vector<32x8xbf16>
    %87 = tpu.transpose %85, [1, 0] : vector<32x8xbf16> -> vector<8x32xbf16>
    %cst_50 = arith.constant dense<0.000000e+00> : vector<16x32xf32>
    %88 = tpu.matmul %84, %87, %cst_50 {dimension_numbers = #tpu.dot_dimension_numbers<[1], [0], [0], [1], [0, 0, 1, 1], [], []>} : vector<16x8xbf16>, vector<8x32xbf16>, vector<16x32xf32> -> vector<16x32xf32>
    %89 = arith.addf %88, %12 : vector<16x32xf32>
    %cst_51 = arith.constant dense<0xFF800000> : vector<16xf32>
    %90 = vector.multi_reduction <maximumf>, %89, %cst_51 [1] : vector<16x32xf32> to vector<16xf32>
    %91 = vector.shape_cast %90 : vector<16xf32> to vector<16x1xf32>
    %92 = vector.broadcast %91 : vector<16x1xf32> to vector<16x32xf32>
    %93 = arith.subf %89, %92 : vector<16x32xf32>
    %94 = math.exp %93 : vector<16x32xf32>
    %cst_52 = arith.constant dense<0.000000e+00> : vector<16xf32>
    %95 = vector.multi_reduction <add>, %94, %cst_52 [1] : vector<16x32xf32> to vector<16xf32>
    %96 = vector.shape_cast %95 : vector<16xf32> to vector<16x1xf32>
    %97 = tpu.reciprocal %96 {approx = true} : vector<16x1xf32> -> vector<16x1xf32>
    %98 = vector.broadcast %97 : vector<16x1xf32> to vector<16x32xf32>
    %99 = arith.mulf %94, %98 : vector<16x32xf32>
    %c2 = arith.constant 2 : index
    %c0_53 = arith.constant 0 : index
    %c0_54 = arith.constant 0 : index
    %c0_55 = arith.constant 0 : index
    %100 = vector.load %arg23[%c2, %c0_53, %c0_54, %c0_55] : memref<4x1x16x32xf32, #tpu.memory_space<vmem>>, vector<1x1x16x32xf32>
    %101 = vector.shape_cast %100 : vector<1x1x16x32xf32> to vector<16x32xf32>
    %102 = vector.shape_cast %99 : vector<16x32xf32> to vector<1x1x16x32xf32>
    tpu.vector_store %arg23[%c2, %c0_53, %c0_54, %c0_55], %102 {strides = array<i32>} : memref<4x1x16x32xf32, #tpu.memory_space<vmem>>, vector<1x1x16x32xf32>,
    %103 = arith.truncf %99 : vector<16x32xf32> to vector<16x32xbf16>
    %cst_56 = arith.constant dense<0.000000e+00> : vector<16x8xf32>
    %104 = tpu.matmul %103, %86, %cst_56 {dimension_numbers = #tpu.dot_dimension_numbers<[1], [0], [0], [1], [0, 0, 1, 1], [], []>} : vector<16x32xbf16>, vector<32x8xbf16>, vector<16x8xf32> -> vector<16x8xf32>
    %105 = arith.truncf %104 : vector<16x8xf32> to vector<16x8xbf16>
    %c16 = arith.constant 16 : index
    %c0_57 = arith.constant 0 : index
    %106 = vector.load %arg12[%c16, %c0_57] : memref<32x32xbf16, #tpu.memory_space<vmem>>, vector<8x32xbf16>
    %cst_58 = arith.constant dense<0.000000e+00> : vector<16x32xf32>
    %107 = tpu.matmul %105, %106, %cst_58 {dimension_numbers = #tpu.dot_dimension_numbers<[1], [0], [0], [1], [0, 0, 1, 1], [], []>} : vector<16x8xbf16>, vector<8x32xbf16>, vector<16x32xf32> -> vector<16x32xf32>
    %108 = arith.addf %83, %107 : vector<16x32xf32>
    %109 = vector.extract_strided_slice %30 {offsets = [0, 24], sizes = [16, 8], strides = [1, 1]} : vector<16x32xbf16> to vector<16x8xbf16>
    %110 = vector.extract_strided_slice %31 {offsets = [0, 24], sizes = [32, 8], strides = [1, 1]} : vector<32x32xbf16> to vector<32x8xbf16>
    %111 = vector.extract_strided_slice %32 {offsets = [0, 24], sizes = [32, 8], strides = [1, 1]} : vector<32x32xbf16> to vector<32x8xbf16>
    %112 = tpu.transpose %110, [1, 0] : vector<32x8xbf16> -> vector<8x32xbf16>
    %cst_59 = arith.constant dense<0.000000e+00> : vector<16x32xf32>
    %113 = tpu.matmul %109, %112, %cst_59 {dimension_numbers = #tpu.dot_dimension_numbers<[1], [0], [0], [1], [0, 0, 1, 1], [], []>} : vector<16x8xbf16>, vector<8x32xbf16>, vector<16x32xf32> -> vector<16x32xf32>
    %114 = arith.addf %113, %12 : vector<16x32xf32>
    %cst_60 = arith.constant dense<0xFF800000> : vector<16xf32>
    %115 = vector.multi_reduction <maximumf>, %114, %cst_60 [1] : vector<16x32xf32> to vector<16xf32>
    %116 = vector.shape_cast %115 : vector<16xf32> to vector<16x1xf32>
    %117 = vector.broadcast %116 : vector<16x1xf32> to vector<16x32xf32>
    %118 = arith.subf %114, %117 : vector<16x32xf32>
    %119 = math.exp %118 : vector<16x32xf32>
    %cst_61 = arith.constant dense<0.000000e+00> : vector<16xf32>
    %120 = vector.multi_reduction <add>, %119, %cst_61 [1] : vector<16x32xf32> to vector<16xf32>
    %121 = vector.shape_cast %120 : vector<16xf32> to vector<16x1xf32>
    %122 = tpu.reciprocal %121 {approx = true} : vector<16x1xf32> -> vector<16x1xf32>
    %123 = vector.broadcast %122 : vector<16x1xf32> to vector<16x32xf32>
    %124 = arith.mulf %119, %123 : vector<16x32xf32>
    %c3 = arith.constant 3 : index
    %c0_62 = arith.constant 0 : index
    %c0_63 = arith.constant 0 : index
    %c0_64 = arith.constant 0 : index
    %125 = vector.load %arg23[%c3, %c0_62, %c0_63, %c0_64] : memref<4x1x16x32xf32, #tpu.memory_space<vmem>>, vector<1x1x16x32xf32>
    %126 = vector.shape_cast %125 : vector<1x1x16x32xf32> to vector<16x32xf32>
    %127 = vector.shape_cast %124 : vector<16x32xf32> to vector<1x1x16x32xf32>
    tpu.vector_store %arg23[%c3, %c0_62, %c0_63, %c0_64], %127 {strides = array<i32>} : memref<4x1x16x32xf32, #tpu.memory_space<vmem>>, vector<1x1x16x32xf32>,
    %128 = arith.truncf %124 : vector<16x32xf32> to vector<16x32xbf16>
    %cst_65 = arith.constant dense<0.000000e+00> : vector<16x8xf32>
    %129 = tpu.matmul %128, %111, %cst_65 {dimension_numbers = #tpu.dot_dimension_numbers<[1], [0], [0], [1], [0, 0, 1, 1], [], []>} : vector<16x32xbf16>, vector<32x8xbf16>, vector<16x8xf32> -> vector<16x8xf32>
    %130 = arith.truncf %129 : vector<16x8xf32> to vector<16x8xbf16>
    %c24 = arith.constant 24 : index
    %c0_66 = arith.constant 0 : index
    %131 = vector.load %arg12[%c24, %c0_66] : memref<32x32xbf16, #tpu.memory_space<vmem>>, vector<8x32xbf16>
    %cst_67 = arith.constant dense<0.000000e+00> : vector<16x32xf32>
    %132 = tpu.matmul %130, %131, %cst_67 {dimension_numbers = #tpu.dot_dimension_numbers<[1], [0], [0], [1], [0, 0, 1, 1], [], []>} : vector<16x8xbf16>, vector<8x32xbf16>, vector<16x32xf32> -> vector<16x32xf32>
    %133 = arith.addf %108, %132 : vector<16x32xf32>
    %c0_68 = arith.constant 0 : index
    %c0_69 = arith.constant 0 : index
    %134 = vector.load %arg13[%c0_68, %c0_69] : memref<1x32xf32, #tpu.memory_space<vmem>>, vector<1x32xf32>
    %135 = vector.broadcast %134 : vector<1x32xf32> to vector<16x32xf32>
    %136 = arith.addf %133, %135 : vector<16x32xf32>
    %137 = arith.extf %3 : vector<16x32xbf16> to vector<16x32xf32>
    %138 = arith.addf %136, %137 : vector<16x32xf32>
    %cst_70 = arith.constant dense<0.000000e+00> : vector<16xf32>
    %139 = vector.multi_reduction <add>, %138, %cst_70 [1] : vector<16x32xf32> to vector<16xf32>
    %140 = vector.shape_cast %139 : vector<16xf32> to vector<16x1xf32>
    %cst_71 = arith.constant 3.200000e+01 : f32
    %141 = vector.broadcast %cst_71 : f32 to vector<16x1xf32>
    %142 = arith.divf %140, %141 : vector<16x1xf32>
    %143 = vector.broadcast %142 : vector<16x1xf32> to vector<16x32xf32>
    %144 = arith.subf %138, %143 : vector<16x32xf32>
    %145 = arith.mulf %144, %144 : vector<16x32xf32>
    %cst_72 = arith.constant dense<0.000000e+00> : vector<16xf32>
    %146 = vector.multi_reduction <add>, %145, %cst_72 [1] : vector<16x32xf32> to vector<16xf32>
    %147 = vector.shape_cast %146 : vector<16xf32> to vector<16x1xf32>
    %cst_73 = arith.constant 3.200000e+01 : f32
    %148 = vector.broadcast %cst_73 : f32 to vector<16x1xf32>
    %149 = arith.divf %147, %148 : vector<16x1xf32>
    %150 = vector.broadcast %142 : vector<16x1xf32> to vector<16x32xf32>
    %151 = arith.subf %138, %150 : vector<16x32xf32>
    %cst_74 = arith.constant 9.99999974E-6 : f32
    %152 = vector.broadcast %cst_74 : f32 to vector<16x1xf32>
    %153 = arith.addf %149, %152 : vector<16x1xf32>
    %154 = math.rsqrt %153 : vector<16x1xf32>
    %155 = vector.broadcast %154 : vector<16x1xf32> to vector<16x32xf32>
    %156 = arith.mulf %151, %155 : vector<16x32xf32>
    %c0_75 = arith.constant 0 : index
    %c0_76 = arith.constant 0 : index
    %157 = vector.load %arg14[%c0_75, %c0_76] : memref<1x32xf32, #tpu.memory_space<vmem>>, vector<1x32xf32>
    %158 = vector.broadcast %157 : vector<1x32xf32> to vector<16x32xf32>
    %159 = arith.mulf %156, %158 : vector<16x32xf32>
    %c0_77 = arith.constant 0 : index
    %c0_78 = arith.constant 0 : index
    %160 = vector.load %arg15[%c0_77, %c0_78] : memref<1x32xf32, #tpu.memory_space<vmem>>, vector<1x32xf32>
    %161 = vector.broadcast %160 : vector<1x32xf32> to vector<16x32xf32>
    %162 = arith.addf %159, %161 : vector<16x32xf32>
    %163 = vector.broadcast %5 : vector<16x1xf32> to vector<16x32xf32>
    %164 = arith.mulf %162, %163 : vector<16x32xf32>
    %165 = arith.truncf %164 : vector<16x32xf32> to vector<16x32xbf16>
    %c0_79 = arith.constant 0 : index
    %c0_80 = arith.constant 0 : index
    %166 = vector.load %arg16[%c0_79, %c0_80] : memref<32x64xbf16, #tpu.memory_space<vmem>>, vector<32x64xbf16>
    %cst_81 = arith.constant dense<0.000000e+00> : vector<16x64xf32>
    %167 = tpu.matmul %165, %166, %cst_81 {dimension_numbers = #tpu.dot_dimension_numbers<[1], [0], [0], [1], [0, 0, 1, 1], [], []>} : vector<16x32xbf16>, vector<32x64xbf16>, vector<16x64xf32> -> vector<16x64xf32>
    %c0_82 = arith.constant 0 : index
    %c0_83 = arith.constant 0 : index
    %168 = vector.load %arg17[%c0_82, %c0_83] : memref<1x64xf32, #tpu.memory_space<vmem>>, vector<1x64xf32>
    %169 = vector.broadcast %168 : vector<1x64xf32> to vector<16x64xf32>
    %170 = arith.addf %167, %169 : vector<16x64xf32>
    %cst_84 = arith.constant 0.000000e+00 : f32
    %171 = vector.broadcast %cst_84 : f32 to vector<16x64xf32>
    %172 = arith.maximumf %170, %171 : vector<16x64xf32>
    %173 = arith.truncf %172 : vector<16x64xf32> to vector<16x64xbf16>
    %c0_85 = arith.constant 0 : index
    %c0_86 = arith.constant 0 : index
    %174 = vector.load %arg18[%c0_85, %c0_86] : memref<64x32xbf16, #tpu.memory_space<vmem>>, vector<64x32xbf16>
    %cst_87 = arith.constant dense<0.000000e+00> : vector<16x32xf32>
    %175 = tpu.matmul %173, %174, %cst_87 {dimension_numbers = #tpu.dot_dimension_numbers<[1], [0], [0], [1], [0, 0, 1, 1], [], []>} : vector<16x64xbf16>, vector<64x32xbf16>, vector<16x32xf32> -> vector<16x32xf32>
    %c0_88 = arith.constant 0 : index
    %c0_89 = arith.constant 0 : index
    %176 = vector.load %arg19[%c0_88, %c0_89] : memref<1x32xf32, #tpu.memory_space<vmem>>, vector<1x32xf32>
    %177 = vector.broadcast %176 : vector<1x32xf32> to vector<16x32xf32>
    %178 = arith.addf %175, %177 : vector<16x32xf32>
    %179 = arith.addf %178, %164 : vector<16x32xf32>
    %cst_90 = arith.constant dense<0.000000e+00> : vector<16xf32>
    %180 = vector.multi_reduction <add>, %179, %cst_90 [1] : vector<16x32xf32> to vector<16xf32>
    %181 = vector.shape_cast %180 : vector<16xf32> to vector<16x1xf32>
    %cst_91 = arith.constant 3.200000e+01 : f32
    %182 = vector.broadcast %cst_91 : f32 to vector<16x1xf32>
    %183 = arith.divf %181, %182 : vector<16x1xf32>
    %184 = vector.broadcast %183 : vector<16x1xf32> to vector<16x32xf32>
    %185 = arith.subf %179, %184 : vector<16x32xf32>
    %186 = arith.mulf %185, %185 : vector<16x32xf32>
    %cst_92 = arith.constant dense<0.000000e+00> : vector<16xf32>
    %187 = vector.multi_reduction <add>, %186, %cst_92 [1] : vector<16x32xf32> to vector<16xf32>
    %188 = vector.shape_cast %187 : vector<16xf32> to vector<16x1xf32>
    %cst_93 = arith.constant 3.200000e+01 : f32
    %189 = vector.broadcast %cst_93 : f32 to vector<16x1xf32>
    %190 = arith.divf %188, %189 : vector<16x1xf32>
    %191 = vector.broadcast %183 : vector<16x1xf32> to vector<16x32xf32>
    %192 = arith.subf %179, %191 : vector<16x32xf32>
    %cst_94 = arith.constant 9.99999974E-6 : f32
    %193 = vector.broadcast %cst_94 : f32 to vector<16x1xf32>
    %194 = arith.addf %190, %193 : vector<16x1xf32>
    %195 = math.rsqrt %194 : vector<16x1xf32>
    %196 = vector.broadcast %195 : vector<16x1xf32> to vector<16x32xf32>
    %197 = arith.mulf %192, %196 : vector<16x32xf32>
    %c0_95 = arith.constant 0 : index
    %c0_96 = arith.constant 0 : index
    %198 = vector.load %arg20[%c0_95, %c0_96] : memref<1x32xf32, #tpu.memory_space<vmem>>, vector<1x32xf32>
    %199 = vector.broadcast %198 : vector<1x32xf32> to vector<16x32xf32>
    %200 = arith.mulf %197, %199 : vector<16x32xf32>
    %c0_97 = arith.constant 0 : index
    %c0_98 = arith.constant 0 : index
    %201 = vector.load %arg21[%c0_97, %c0_98] : memref<1x32xf32, #tpu.memory_space<vmem>>, vector<1x32xf32>
    %202 = vector.broadcast %201 : vector<1x32xf32> to vector<16x32xf32>
    %203 = arith.addf %200, %202 : vector<16x32xf32>
    %204 = vector.broadcast %5 : vector<16x1xf32> to vector<16x32xf32>
    %205 = arith.mulf %203, %204 : vector<16x32xf32>
    %c0_99 = arith.constant 0 : index
    %c0_100 = arith.constant 0 : index
    %c0_101 = arith.constant 0 : index
    %206 = vector.load %arg22[%c0_99, %c0_100, %c0_101] : memref<1x16x32xf32, #tpu.memory_space<vmem>>, vector<1x16x32xf32>
    %207 = vector.shape_cast %206 : vector<1x16x32xf32> to vector<16x32xf32>
    %208 = vector.shape_cast %205 : vector<16x32xf32> to vector<1x16x32xf32>
    tpu.vector_store %arg22[%c0_99, %c0_100, %c0_101], %208 {strides = array<i32>} : memref<1x16x32xf32, #tpu.memory_space<vmem>>, vector<1x16x32xf32>,
    return
  }
  func.func @transform_0(%arg0: i32, %arg1: i32) -> (i32, i32, i32) {
    %c0_i32 = arith.constant 0 : i32
    %c0_i32_0 = arith.constant 0 : i32
    %c0_i32_1 = arith.constant 0 : i32
    return %arg0, %c0_i32, %c0_i32_0 : i32, i32, i32
  }
  func.func @transform_1(%arg0: i32, %arg1: i32) -> (i32, i32, i32) {
    %c0_i32 = arith.constant 0 : i32
    %c0_i32_0 = arith.constant 0 : i32
    return %arg0, %arg1, %c0_i32 : i32, i32, i32
  }
  func.func @transform_2(%arg0: i32, %arg1: i32) -> (i32, i32, i32) {
    %c0_i32 = arith.constant 0 : i32
    %c0_i32_0 = arith.constant 0 : i32
    return %arg0, %arg1, %c0_i32 : i32, i32, i32
  }
  func.func @transform_3(%arg0: i32, %arg1: i32) -> (i32, i32, i32) {
    %c0_i32 = arith.constant 0 : i32
    %c0_i32_0 = arith.constant 0 : i32
    return %arg0, %arg1, %c0_i32 : i32, i32, i32
  }
  func.func @transform_4(%arg0: i32, %arg1: i32) -> (i32, i32) {
    %c0_i32 = arith.constant 0 : i32
    %c0_i32_0 = arith.constant 0 : i32
    %c0_i32_1 = arith.constant 0 : i32
    return %c0_i32, %c0_i32_0 : i32, i32
  }
  func.func @transform_5(%arg0: i32, %arg1: i32) -> (i32, i32) {
    %c0_i32 = arith.constant 0 : i32
    %c0_i32_0 = arith.constant 0 : i32
    %c0_i32_1 = arith.constant 0 : i32
    return %c0_i32, %c0_i32_0 : i32, i32
  }
  func.func @transform_6(%arg0: i32, %arg1: i32) -> (i32, i32) {
    %c0_i32 = arith.constant 0 : i32
    %c0_i32_0 = arith.constant 0 : i32
    %c0_i32_1 = arith.constant 0 : i32
    return %c0_i32, %c0_i32_0 : i32, i32
  }
  func.func @transform_7(%arg0: i32, %arg1: i32) -> (i32, i32) {
    %c0_i32 = arith.constant 0 : i32
    %c0_i32_0 = arith.constant 0 : i32
    %c0_i32_1 = arith.constant 0 : i32
    return %c0_i32, %c0_i32_0 : i32, i32
  }
  func.func @transform_8(%arg0: i32, %arg1: i32) -> (i32, i32) {
    %c0_i32 = arith.constant 0 : i32
    %c0_i32_0 = arith.constant 0 : i32
    %c0_i32_1 = arith.constant 0 : i32
    return %c0_i32, %c0_i32_0 : i32, i32
  }
  func.func @transform_9(%arg0: i32, %arg1: i32) -> (i32, i32) {
    %c0_i32 = arith.constant 0 : i32
    %c0_i32_0 = arith.constant 0 : i32
    %c0_i32_1 = arith.constant 0 : i32
    return %c0_i32, %c0_i32_0 : i32, i32
  }
  func.func @transform_10(%arg0: i32, %arg1: i32) -> (i32, i32) {
    %c0_i32 = arith.constant 0 : i32
    %c0_i32_0 = arith.constant 0 : i32
    %c0_i32_1 = arith.constant 0 : i32
    return %c0_i32, %c0_i32_0 : i32, i32
  }
  func.func @transform_11(%arg0: i32, %arg1: i32) -> (i32, i32) {
    %c0_i32 = arith.constant 0 : i32
    %c0_i32_0 = arith.constant 0 : i32
    %c0_i32_1 = arith.constant 0 : i32
    return %c0_i32, %c0_i32_0 : i32, i32
  }
  func.func @transform_12(%arg0: i32, %arg1: i32) -> (i32, i32) {
    %c0_i32 = arith.constant 0 : i32
    %c0_i32_0 = arith.constant 0 : i32
    %c0_i32_1 = arith.constant 0 : i32
    return %c0_i32, %c0_i32_0 : i32, i32
  }
  func.func @transform_13(%arg0: i32, %arg1: i32) -> (i32, i32) {
    %c0_i32 = arith.constant 0 : i32
    %c0_i32_0 = arith.constant 0 : i32
    %c0_i32_1 = arith.constant 0 : i32
    return %c0_i32, %c0_i32_0 : i32, i32
  }
  func.func @transform_14(%arg0: i32, %arg1: i32) -> (i32, i32) {
    %c0_i32 = arith.constant 0 : i32
    %c0_i32_0 = arith.constant 0 : i32
    %c0_i32_1 = arith.constant 0 : i32
    return %c0_i32, %c0_i32_0 : i32, i32
  }
  func.func @transform_15(%arg0: i32, %arg1: i32) -> (i32, i32) {
    %c0_i32 = arith.constant 0 : i32
    %c0_i32_0 = arith.constant 0 : i32
    %c0_i32_1 = arith.constant 0 : i32
    return %c0_i32, %c0_i32_0 : i32, i32
  }
  func.func @transform_16(%arg0: i32, %arg1: i32) -> (i32, i32) {
    %c0_i32 = arith.constant 0 : i32
    %c0_i32_0 = arith.constant 0 : i32
    %c0_i32_1 = arith.constant 0 : i32
    return %c0_i32, %c0_i32_0 : i32, i32
  }
  func.func @transform_17(%arg0: i32, %arg1: i32) -> (i32, i32) {
    %c0_i32 = arith.constant 0 : i32
    %c0_i32_0 = arith.constant 0 : i32
    %c0_i32_1 = arith.constant 0 : i32
    return %c0_i32, %c0_i32_0 : i32, i32
  }
  func.func @transform_18(%arg0: i32, %arg1: i32) -> (i32, i32) {
    %c0_i32 = arith.constant 0 : i32
    %c0_i32_0 = arith.constant 0 : i32
    %c0_i32_1 = arith.constant 0 : i32
    return %c0_i32, %c0_i32_0 : i32, i32
  }
  func.func @transform_19(%arg0: i32, %arg1: i32) -> (i32, i32) {
    %c0_i32 = arith.constant 0 : i32
    %c0_i32_0 = arith.constant 0 : i32
    %c0_i32_1 = arith.constant 0 : i32
    return %c0_i32, %c0_i32_0 : i32, i32
  }
  func.func @transform_20(%arg0: i32, %arg1: i32) -> (i32, i32, i32) {
    %c0_i32 = arith.constant 0 : i32
    %c0_i32_0 = arith.constant 0 : i32
    return %arg0, %arg1, %c0_i32 : i32, i32, i32
  }
  func.func @transform_21(%arg0: i32, %arg1: i32) -> (i32, i32, i32, i32) {
    %c0_i32 = arith.constant 0 : i32
    %c0_i32_0 = arith.constant 0 : i32
    %c0_i32_1 = arith.constant 0 : i32
    return %c0_i32, %arg0, %arg1, %c0_i32_0 : i32, i32, i32, i32
  }
}

</mosaic_0001>

<bundles_post_ra>
// kernel: tpu_custom_call.1
= control target key start
LH: loop header
LB: loop body
LE: loop exit
PB: predicated region body
PF: predicated region fallthrough
CT: control target
= control target key end

     0   :  { %s3980_s0 = inlined_call_operand.vmem [shape: bf16[2,32,32], index: 0, kind: input, shape index: {}]   ;;  %s3981_s1 = inlined_call_operand.hbm [shape: bf16[2,32,32], index: 1, kind: input, shape index: {}]   ;;  %s3982_s2 = inlined_call_operand.vmem [shape: f32[2,32,1], index: 2, kind: input, shape index: {}]   ;;  %s3983_s3 = inlined_call_operand.vmem [shape: f32[2,32,32], index: 3, kind: input, shape index: {}]   ;;  %s3984_s4 = inlined_call_operand.vmem [shape: bf16[32,32], index: 4, kind: input, shape index: {}]   ;;  %s3985_s5 = inlined_call_operand.hbm [shape: f32[1,32], index: 5, kind: input, shape index: {}]   ;;  %s3986_s6 = inlined_call_operand.vmem [shape: bf16[32,32], index: 6, kind: input, shape index: {}]   ;;  %s3987_s7 = inlined_call_operand.hbm [shape: f32[1,32], index: 7, kind: input, shape index: {}]   ;;  %s3988_s8 = inlined_call_operand.hbm [shape: bf16[32,32], index: 8, kind: input, shape index: {}]   ;;  %s3989_s9 = inlined_call_operand.vmem [shape: f32[1,32], index: 9, kind: input, shape index: {}]   ;;  %s3990_s10 = inlined_call_operand.hbm [shape: bf16[32,32], index: 10, kind: input, shape index: {}]   ;;  %s3991_s11 = inlined_call_operand.vmem [shape: f32[1,32], index: 11, kind: input, shape index: {}]   ;;  %s3992_s12 = inlined_call_operand.vmem [shape: f32[1,32], index: 12, kind: input, shape index: {}]   ;;  %s3993_s13 = inlined_call_operand.hbm [shape: f32[1,32], index: 13, kind: input, shape index: {}]   ;;  %s3994_s14 = inlined_call_operand.vmem [shape: bf16[32,64], index: 14, kind: input, shape index: {}]   ;;  %s3995_s15 = inlined_call_operand.vmem [shape: f32[1,64], index: 15, kind: input, shape index: {}]   ;;  %s3996_s16 = inlined_call_operand.vmem [shape: bf16[64,32], index: 16, kind: input, shape index: {}]   ;;  %s3997_s17 = inlined_call_operand.vmem [shape: f32[1,32], index: 17, kind: input, shape index: {}]   ;;  %s3998_s18 = inlined_call_operand.vmem [shape: f32[1,32], index: 18, kind: input, shape index: {}]   ;;  %s3999_s19 = inlined_call_operand.vmem [shape: f32[1,32], index: 19, kind: input, shape index: {}]   ;;  %s4000_s20 = inlined_call_operand.hbm [shape: f32[2,32,32], index: 20, kind: output, shape index: {0}]   ;;  %s4001_s21 = inlined_call_operand.hbm [shape: f32[4,2,32,32], index: 21, kind: output, shape index: {1}]  }
   0x1   :  { %4021 = sst [smem:[#allocation27_spill]] %s3980_s0 }
   0x2   :  { %4022 = sst [smem:[#allocation28_spill]] %s3981_s1 }
   0x3   :  { %4023 = sst [smem:[#allocation29_spill]] %s3982_s2 }
   0x4   :  { %4024 = sst [smem:[#allocation30_spill]] %s3983_s3 }
   0x5   :  { %4025 = sst [smem:[#allocation31_spill]] %s3984_s4 }
   0x6   :  { %4026 = sst [smem:[#allocation32_spill]] %s3985_s5 }
   0x7   :  { %4027 = sst [smem:[#allocation33_spill]] %s3987_s7 }
   0x8   :  { %4028 = sst [smem:[#allocation34_spill]] %s3988_s8 }
   0x9   :  { %4029 = sst [smem:[#allocation35_spill]] %s3990_s10 }
   0xa   :  { %4030 = sst [smem:[#allocation36_spill]] %s3991_s11 }
   0xb   :  { %4031 = sst [smem:[#allocation37_spill]] %s3992_s12 }
   0xc   :  { %4032 = sst [smem:[#allocation38_spill]] %s3993_s13 }
   0xd   :  { %4033 = sst [smem:[#allocation39_spill]] %s3994_s14 }
   0xe   :  { %4034 = sst [smem:[#allocation40_spill]] %s3995_s15 }
   0xf   :  { %4035 = sst [smem:[#allocation41_spill]] %s3996_s16 }
  0x10   :  { %4036 = sst [smem:[#allocation42_spill]] %s3997_s17 }
  0x11   :  { %4037 = sst [smem:[#allocation43_spill]] %s3998_s18 }
  0x12   :  { %4038 = sst [smem:[#allocation44_spill]] %s3999_s19 }
  0x13   :  { %4039 = sst [smem:[#allocation45_spill]] %s4000_s20 }
  0x14   :  { %4040 = sst [smem:[#allocation46_spill]] %s4001_s21 }
  0x15   :  { %27 = vsyncpa [#allocation3], 0 }
  0x16   :  { %29 = vsyncpa [#allocation3 + $0x1], 0 }
  0x17   :  { %30 = vsyncpa [#allocation6], 0 }
  0x18   :  { %31 = vsyncpa [#allocation9], 0 }
  0x19   :  { %32 = vsyncpa [#allocation12], 0 }
  0x1a   :  { %33 = vsyncpa [#allocation4], 0 }
  0x1b   :  { %35 = vsyncpa [#allocation4 + $0x1], 0 }
  0x1c   :  { %36 = vsyncpa [#allocation15], 0 }
  0x1d   :  { %38 = vsyncpa [#allocation15 + $0x1], 0  ;;  %s3318_s2 = smov 0   ;;  %s3320_s25 = smov 0  }
  0x1e   :  { %s3322_s26 = smov 0   ;;  %s3324_s27 = smov 0  }
  0x1f   :  { %s3326_s3 = smov 0   ;;  %s3328_s28 = smov 0  }
  0x20   :  { %s3330_s29 = smov 0   ;;  %s3332_s0 = smov 0  }
  0x21 LB: > { %4041 = sst [smem:[#allocation24_spill]] %s3154_s2  ;;  %s4005_s4 = sadd.s32 4294967295, %s3182_s0   ;;  %s3182_s0 = sphi %s3332_s0, %s44_s0   ;;  %s3178_s29 = sphi %s3330_s29, %s4091_s29   ;;  %s3174_s28 = sphi %s3328_s28, %s4090_s28   ;;  %s3170_s3 = sphi %s3326_s3, %s4089_s3   ;;  %s3166_s27 = sphi %s3324_s27, %s4088_s27   ;;  %s3162_s26 = sphi %s3322_s26, %s4087_s26   ;;  %s3158_s25 = sphi %s3320_s25, %s4086_s25   ;;  %s3154_s2 = sphi %s3318_s2, %s4085_s2  }
  0x22   : > { %p2411_p0 = scmp.ge.s32.totalorder %s3182_s0, 1  ;;  %p3362_p1 = scmp.eq.s32.totalorder %s4005_s4, 0 }
  0x23   : > { %p563_p2 = scmp.lt.s32.totalorder %s3182_s0, 5  ;;  %s3184_s22 = smov [#allocation5]  }
  0x24   : > { %s4042_s30 = scalar_select %p3362_p1, 1, 0 }
  0x25   : > { %p3367_p3 = pnand %p2411_p0, %p563_p2  ;;  %s579_s23 = sshll.u32 %s3184_s22, 4  ;;  %s580_s23 = int_to_ptr.vmem [resolvable:$true] %s579_s23 }
  0x26   : > { %s3185_s1 = smov [#allocation8]   ;;  %s3186_s21 = smov [#allocation7]  }
  0x27   : > { %s4043_s5 = scalar_select %p3367_p3, 1, 0 }
  0x28   : > { %p2715_p4 = pneg %p3367_p3  ;;  %s603_s24 = sshll.u32 %s3185_s1, 4  ;;  %s3379_s24 = int_to_ptr.vmem [resolvable:$true] %s603_s24 }
  0x29   : > { %s3381_s20 = sshll.u32 %s3186_s21, 4  ;;  %s4045_s17 = sld [smem:[#allocation32_spill]]  ;;  %s594_s20 = int_to_ptr.vmem [resolvable:$true] %s3381_s20 }
  0x2a   : > { %p3375_p5 = pnand %p2715_p4, %p3362_p1 }
  0x2c   : > { %p3391_p7 = pneg %p3375_p5 }
  0x2f   : > { %s2898_s22 = scalar_lea.hbm %s4045_s17, 16 }
  0x30   : > { %p2899_p6 = scmp.ne.s32.totalorder %s4045_s17, %s2898_s22  ;;  %p2905_p10 = scmp.lt.u32.totalorder %s2898_s22, %s4045_s17 }
  0x32   : > { %p2901_p8 = pnand %p3391_p7, %p2899_p6 }
  0x34   : > { %p2902_p9 = pneg %p2901_p8 }
  0x36   : > { %p2907_p11 = pnand %p2905_p10, %p2902_p9 }
  0x38   : > { %2910 = shalt.err (!%p2907_p11)
}
  0x39   : > { %s2911_s18 = scalar_lea.vmem %s580_s23, 16  ;;  %s2918_s12 = scalar_lea.vmem %s580_s23, 32 }
  0x3a   : > { %p2912_p12 = scmp.ne.s32.totalorder %s580_s23, %s2911_s18  ;;  %p2919_p2 = scmp.lt.s32.totalorder %s580_s23, %s580_s23 }
  0x3b   : > { %p2920_p4 = scmp.lt.s32.totalorder %s2918_s12, %s2911_s18 }
  0x3c   : > { %p2914_p13 = pnand %p2912_p12, %p3391_p7 }
  0x3d   : > { %p2921_p3 = por %p2920_p4, %p2919_p2 }
  0x3e   : > { %p2915_p0 = pneg %p2914_p13 }
  0x40   : > { %p2922_p1 = pnand %p2921_p3, %p2915_p0 }
  0x42   : > { %2925 = shalt.err (!%p2922_p1)
}
  0x43   : > { %2718 = dma.hbm_to_vmem [thread:$0]  (!%p3375_p5), %s4045_s17, 16, %s580_s23, [#allocation6]  }
  0x44   : > { %s4047_s8 = sld [smem:[#allocation34_spill]] }
  0x4a   : > { %s2926_s21 = scalar_lea.hbm %s4047_s8, 256 }
  0x4b   : > { %p2927_p6 = scmp.ne.s32.totalorder %s4047_s8, %s2926_s21  ;;  %p2933_p1 = scmp.lt.u32.totalorder %s2926_s21, %s4047_s8 }
  0x4d   : > { %p2929_p8 = pnand %p2927_p6, %p3391_p7 }
  0x4f   : > { %p2930_p9 = pneg %p2929_p8 }
  0x51   : > { %p2935_p3 = pnand %p2933_p1, %p2930_p9 }
  0x53   : > { %2938 = shalt.err (!%p2935_p3)
}
  0x54   : > { %s2939_s23 = scalar_lea.vmem %s3379_s24, 256  ;;  %p2947_p13 = scmp.lt.s32.totalorder %s3379_s24, %s3379_s24 }
  0x55   : > { %p2940_p10 = scmp.ne.s32.totalorder %s3379_s24, %s2939_s23  ;;  %p2948_p0 = scmp.lt.s32.totalorder %s2939_s23, %s2939_s23 }
  0x57   : > { %p2942_p11 = pnand %p2940_p10, %p3391_p7  ;;  %p2949_p2 = por %p2948_p0, %p2947_p13 }
  0x59   : > { %p2943_p12 = pneg %p2942_p11 }
  0x5b   : > { %p2950_p4 = pnand %p2949_p2, %p2943_p12 }
  0x5d   : > { %2953 = shalt.err (!%p2950_p4)
}
  0x5e   : > { %s4013_s11 = smov 64   ;;  %s4015_s14 = smov 4  }
  0x5f   : > { %2724 = dma.hbm_to_vmem [thread:$0]  (!%p3375_p5), %s4047_s8, 256, %s3379_s24, [#allocation9], %s4013_s11, %s4013_s11, %s4015_s14  }
  0x60   : > { %s4048_s7 = sld [smem:[#allocation33_spill]] }
  0x66   : > { %s2954_s21 = scalar_lea.hbm %s4048_s7, 16 }
  0x67   : > { %p2955_p6 = scmp.ne.s32.totalorder %s4048_s7, %s2954_s21  ;;  %p2961_p1 = scmp.lt.u32.totalorder %s2954_s21, %s4048_s7 }
  0x69   : > { %p2957_p8 = pnand %p2955_p6, %p3391_p7 }
  0x6b   : > { %p2958_p9 = pneg %p2957_p8 }
  0x6d   : > { %p2963_p3 = pnand %p2961_p1, %p2958_p9 }
  0x6f   : > { %2966 = shalt.err (!%p2963_p3)
}
  0x70   : > { %s2967_s15 = scalar_lea.vmem %s594_s20, 16  ;;  %s2974_s24 = scalar_lea.vmem %s594_s20, 32 }
  0x71   : > { %p2968_p10 = scmp.ne.s32.totalorder %s594_s20, %s2967_s15  ;;  %p2975_p13 = scmp.lt.s32.totalorder %s594_s20, %s594_s20 }
  0x72   : > { %p2976_p0 = scmp.lt.s32.totalorder %s2974_s24, %s2967_s15 }
  0x73   : > { %p2970_p11 = pnand %p2968_p10, %p3391_p7 }
  0x74   : > { %p2977_p2 = por %p2976_p0, %p2975_p13 }
  0x75   : > { %p2971_p12 = pneg %p2970_p11 }
  0x77   : > { %p2978_p4 = pnand %p2977_p2, %p2971_p12 }
  0x79   : > { %2981 = shalt.err (!%p2978_p4)
}
  0x7a   : > { %2721 = dma.hbm_to_vmem [thread:$0]  (!%p3375_p5), %s4048_s7, 16, %s594_s20, [#allocation6]  }
  0x7b   : > { %s3189_s17 = smov [#allocation10]   ;;  %s3190_s21 = smov [#allocation11]  }
  0x7c   : > { %s619_s22 = sshll.u32 %s3189_s17, 4  ;;  %s639_s18 = sshll.u32 %s3190_s21, 4  ;;  %s620_s22 = int_to_ptr.vmem [resolvable:$true] %s619_s22  ;;  %s640_s18 = int_to_ptr.vmem [resolvable:$true] %s639_s18 }
  0x7d   : > { %s4049_s10 = sld [smem:[#allocation35_spill]] }
  0x83   : > { %s2982_s11 = scalar_lea.hbm %s4049_s10, 256 }
  0x84   : > { %p2983_p6 = scmp.ne.s32.totalorder %s4049_s10, %s2982_s11  ;;  %p2989_p1 = scmp.lt.u32.totalorder %s2982_s11, %s4049_s10 }
  0x86   : > { %p2985_p8 = pnand %p2983_p6, %p3391_p7 }
  0x88   : > { %p2986_p9 = pneg %p2985_p8 }
  0x8a   : > { %p2991_p3 = pnand %p2989_p1, %p2986_p9 }
  0x8c   : > { %2994 = shalt.err (!%p2991_p3)
}
  0x8d   : > { %s2995_s20 = scalar_lea.vmem %s620_s22, 256  ;;  %p3003_p13 = scmp.lt.s32.totalorder %s620_s22, %s620_s22 }
  0x8e   : > { %p2996_p10 = scmp.ne.s32.totalorder %s620_s22, %s2995_s20  ;;  %p3004_p0 = scmp.lt.s32.totalorder %s2995_s20, %s2995_s20 }
  0x90   : > { %p2998_p11 = pnand %p2996_p10, %p3391_p7  ;;  %p3005_p2 = por %p3004_p0, %p3003_p13 }
  0x92   : > { %p2999_p12 = pneg %p2998_p11 }
  0x94   : > { %p3006_p4 = pnand %p3005_p2, %p2999_p12 }
  0x96   : > { %3009 = shalt.err (!%p3006_p4)
}
  0x97   : > { %s4050_s16 = smov 4   ;;  %s4051_s17 = smov 64  }
  0x98   : > { %2727 = dma.hbm_to_vmem [thread:$0]  (!%p3375_p5), %s4049_s10, 256, %s620_s22, [#allocation9], %s4051_s17, %s4051_s17, %s4050_s16  }
  0x99   : > { %s4052_s13 = sld [smem:[#allocation38_spill]] }
  0x9f   : > { %s3010_s23 = scalar_lea.hbm %s4052_s13, 16 }
  0xa0   : > { %p3011_p6 = scmp.ne.s32.totalorder %s4052_s13, %s3010_s23  ;;  %p3017_p1 = scmp.lt.u32.totalorder %s3010_s23, %s4052_s13 }
  0xa2   : > { %p3013_p8 = pnand %p3011_p6, %p3391_p7 }
  0xa4   : > { %p3014_p9 = pneg %p3013_p8 }
  0xa6   : > { %p3019_p3 = pnand %p3017_p1, %p3014_p9 }
  0xa8   : > { %3022 = shalt.err (!%p3019_p3)
}
  0xa9   : > { %s3023_s14 = scalar_lea.vmem %s640_s18, 16  ;;  %s3030_s22 = scalar_lea.vmem %s640_s18, 32 }
  0xaa   : > { %p3024_p10 = scmp.ne.s32.totalorder %s640_s18, %s3023_s14  ;;  %p3031_p13 = scmp.lt.s32.totalorder %s640_s18, %s640_s18 }
  0xab   : > { %p3032_p0 = scmp.lt.s32.totalorder %s3030_s22, %s3023_s14 }
  0xac   : > { %p3026_p11 = pnand %p3024_p10, %p3391_p7 }
  0xad   : > { %p3033_p2 = por %p3032_p0, %p3031_p13 }
  0xae   : > { %p3027_p12 = pneg %p3026_p11 }
  0xb0   : > { %p3034_p4 = pnand %p3033_p2, %p3027_p12 }
  0xb2   : > { %3037 = shalt.err (!%p3034_p4)
}
  0xb3   : > { %2730 = dma.hbm_to_vmem [thread:$0]  (!%p3375_p5), %s4052_s13, 16, %s640_s18, [#allocation12]  }
  0xb4   : > { %s2410_s1 = sadd.s32 4294967294, %s3182_s0   ;;  %s53_s12 = sadd.s32 1, %s3174_s28 }
  0xb5   : > { %s56_s4 = sadd.s32 1, %s3178_s29  ;;  %p54_p7 = scmp.ge.s32.totalorder %s53_s12, 2 }
  0xb6   : > { %s91_s23 = sadd.s32 1, %s3162_s26  ;;  %p98_p6 = scmp.ne.s32.totalorder %s3162_s26, %s3158_s25 }
  0xb7   : > { %p99_p8 = scmp.eq.s32.totalorder %s3182_s0, 0  ;;  %s4093_s12 = smov (%p54_p7, %s53_s12), 0 }
  0xb8   : > { %4053 = sst [smem:[#allocation25_spill]] %s4093_s12  ;;  %s4095_s4 = smov (!%p54_p7, %s56_s4), %s3178_s29 }
  0xb9   : > { %s87_s15 = ssub.s32 %s3174_s28, %s4093_s12  ;;  %p3503_p9 = por %p99_p8, %p98_p6 }
  0xba   : > { %p58_p5 = scmp.ge.s32.totalorder %s4095_s4, 2  ;;  %p104_p1 = scmp.ne.s32.totalorder %s3158_s25, %s3154_s2 }
  0xbb   : > { %s4055_s18 = sadd.s32 4294967295, %s3182_s0   ;;  %p528_p10 = scmp.eq.s32.totalorder %s2410_s1, 3 }
  0xbc   : > { %p522_p3 = scmp.eq.s32.totalorder %s4055_s18, 3  ;;  %s4097_s4 = smov (%p58_p5, %s4095_s4), 0 }
  0xbd   : > { %4056 = sst [smem:[#allocation26_spill]] %s4097_s4  ;;  %p4057_p11 = scmp.ne.s32.totalorder %s4042_s30, 0 }
  0xbe   : > { %p3519_p13 = por %p522_p3, %p98_p6  ;;  %s86_s14 = ssub.s32 %s3178_s29, %s4097_s4 }
  0xbf   : > { %p3515_p12 = por %p4057_p11, %p104_p1  ;;  %p3525_p0 = por %p528_p10, %p104_p1 }
  0xc0   : > { %s4059_s20 = scalar_select %p3519_p13, 1, 0 }
  0xc1   : > { %s4060_s22 = scalar_select %p3525_p0, 1, 0 }
  0xc2   : > { %s88_s11 = sor.u32 %s87_s15, %s86_s14  ;;  %p2747_p2 = scmp.lt.s32.totalorder %s3182_s0, 4 }
  0xc3   : > { %p89_p4 = scmp.eq.s32.totalorder %s88_s11, 0  ;;  %s676_s21 = sand.u32 1, %s3162_s26  }
  0xc4   : > { %s2418_s1 = sshll.u32 %s676_s21, 3  ;;  %s2419_s7 = sshll.u32 %s3174_s28, 1 }
  0xc5   : > { %s3532_s18 = scalar_select %p89_p4, %s3162_s26, %s91_s23  }
  0xc6   : > { %s2420_s8 = sshll.u32 %s3178_s29, 2  ;;  %s680_s10 = scalar_lea.vmem [#allocation2], %s2418_s1 }
  0xc7   : > { %s689_s13 = sshll.u32 %s680_s10, 4  ;;  %s686_s12 = sadd.s32 %s2420_s8, %s2419_s7  ;;  %s3536_s13 = int_to_ptr.vmem [resolvable:$true] %s689_s13 }
  0xc8   : > { %s2421_s2 = sshll.u32 %s686_s12, 6  ;;  %p3540_p7 = pnand %p2747_p2, %p3503_p9 }
  0xc9   : > { %s4062_s11 = sld [smem:[#allocation28_spill]]  ;;  %s3549_s7 = scalar_lea.sflag [#allocation3], %s676_s21 }
  0xca   : > { %p3040_p8 = pneg %p3540_p7 }
  0xcf   : > { %s3547_s23 = scalar_lea.hbm %s4062_s11, %s2421_s2  ;;  %s3043_s24 = scalar_lea.hbm %s4062_s11, 512 }
  0xd0   : > { %s3038_s8 = scalar_lea.hbm %s3547_s23, 128  ;;  %p3044_p1 = scmp.lt.u32.totalorder %s3547_s23, %s4062_s11 }
  0xd1   : > { %p3039_p6 = scmp.ne.s32.totalorder %s3547_s23, %s3038_s8  ;;  %p3045_p3 = scmp.lt.u32.totalorder %s3043_s24, %s3038_s8 }
  0xd2   : > { %p3047_p11 = scmp.lt.u32.totalorder %s3038_s8, %s3547_s23 }
  0xd3   : > { %p3041_p9 = pnand %p3040_p8, %p3039_p6  ;;  %p3046_p10 = por %p3045_p3, %p3044_p1 }
  0xd5   : > { %p3042_p5 = pneg %p3041_p9  ;;  %p3048_p2 = por %p3047_p11, %p3046_p10 }
  0xd7   : > { %p3049_p4 = pnand %p3048_p2, %p3042_p5 }
  0xd9   : > { %3052 = shalt.err (!%p3049_p4)
}
  0xda   : > { %s3053_s21 = scalar_lea.vmem %s3536_s13, 128  ;;  %s3191_s15 = smov [#allocation2]  }
  0xdb   : > { %p3054_p6 = scmp.ne.s32.totalorder %s3536_s13, %s3053_s21  ;;  %s3058_s14 = sshll.u32 %s3191_s15, 4  ;;  %s3059_s14 = int_to_ptr.vmem [resolvable:$false] %s3058_s14 }
  0xdc   : > { %s3060_s10 = scalar_lea.vmem %s3059_s14, 256  ;;  %p3061_p13 = scmp.lt.s32.totalorder %s3536_s13, %s3059_s14 }
  0xdd   : > { %p3056_p9 = pnand %p3054_p6, %p3040_p8  ;;  %p3062_p1 = scmp.lt.s32.totalorder %s3060_s10, %s3053_s21 }
  0xdf   : > { %p3057_p0 = pneg %p3056_p9  ;;  %p3063_p3 = por %p3062_p1, %p3061_p13 }
  0xe1   : > { %p3064_p10 = pnand %p3063_p3, %p3057_p0 }
  0xe3   : > { %3067 = shalt.err (!%p3064_p10)
}
  0xe4   : > { %2734 = dma.hbm_to_vmem [thread:$0]  (!%p3540_p7), %s3547_s23, 128, %s3536_s13, %s3549_s7, %s4051_s17, %s4051_s17, %s4050_s16  }
  0xe5   : > { %p4063_p8 = scmp.ne.s32.totalorder %s4043_s5, 0 }
  0xe6   : > { %s3583_s8 = sand.u32 (!%p4063_p8), 1, %s3158_s25  }
  0xe7   : > { %727 = sbr.rel (%p4063_p8) target bundleno = 4098 (0x1002), region = 100  ;;  %s2423_s12 = sshll.u32 (!%p4063_p8), %s3583_s8, 3 }
  0xe8   : > { %s730_s24 = scalar_lea.sflag (!%p4063_p8), [#allocation3], %s3583_s8  ;;  %s733_s2 = scalar_lea.vmem (!%p4063_p8), [#allocation2], %s2423_s12 }
  0xee   : > { %3129 = dma.done.wait (%p3515_p12), %s730_s24, 128  }
  0xef   : > { %3131 = vsyncadd (%p3515_p12), %s730_s24, 4294967168  ;;  %p4064_p13 = scmp.ne.s32.totalorder %s4042_s30, 0 }
  0xf1   : > { %3133 = dma.done.wait (%p4064_p13), [#allocation6], 32  }
  0xf2   : > { %3135 = vsyncadd (%p4064_p13), [#allocation6], 4294967264 }
  0xf3   : > { %3137 = dma.done.wait (%p4064_p13), [#allocation9], 512  }
  0xf4   : > { %3139 = vsyncadd (%p4064_p13), [#allocation9], 4294966784 }
  0xf5   : > { %3141 = dma.done.wait (%p4064_p13), [#allocation12], 16  }
  0xf6   : > { %3143 = vsyncadd (%p4064_p13), [#allocation12], 4294967280  ;;  %p840_p12 = scmp.lt.s32.totalorder %s3170_s3, 1  ;;  %v3192_v0 = vmov 0.0   ;;  %vm3193_vm0 = vmmov 0   ;;  %s4065_s4 = sld [smem:[#allocation27_spill]] }
  0xf7   : > { %2567 = vmatprep.subr.bf16.mxu0 %v3192_v0  ;;  %2571 = vmatprep.mubr.msk.bf16.mxu0 %vm3193_vm0, %v3192_v0  ;;  %v2842_v1 = vld [vmem:[%s3986_s6] sm:$0xff]   ;;  %v2843_v2 = vld [vmem:[%s3986_s6 + $0x8] sm:$0xff]   ;;  %vm916_vm1 = vcmask 261120   ;;  %s4066_s14 = sld [smem:[#allocation31_spill]]  ;;  %v2849_v8 = vld [vmem:[#allocation8] sm:$0xff]   ;;  %vm1123_vm2 = vcmask 64512  }
  0xf8   : > { %s3608_s13 = scalar_select %p840_p12, %s3170_s3, 1  ;;  %2551 = vmatprep.subr.bf16.mxu1 %v2842_v1  ;;  %v3627_v7 = vld [vmem:[%s733_s2] sm:$0xff]   ;;  %v2439_v11 = vld [vmem:[#allocation7] ss:$0 sm:$0xff]  ;;  %v2451_v13 = vld [vmem:[#allocation5] ss:$0 sm:$0xff] }
  0xf9   : > { %2552 = vmatpush3.bf16.msra.mxu1 %v2842_v1  ;;  %v2850_v9 = vld [vmem:[#allocation8 + $0x8] sm:$0xff]   ;;  %s4067_s7 = sld [smem:[#allocation30_spill]]  ;;  %vm1387_vm5 = vcmask 1043456   ;;  %s3195_s15 = smov 112   ;;  %vm2025_vm6 = vcmask 523264  }
  0xfa   : > { %s2499_s5 = sshll.u32 %s3608_s13, 4  ;;  %2553 = vmatprep.subr.bf16.mxu1 %v2843_v2  ;;  %v2446_v29 = vld [vmem:[%s3989_s9] ss:$0 sm:$0xff]  ;;  %s2434_s17 = sshll.u32 %s3608_s13, 2 }
  0xfb   : > { %s2430_s13 = sshll.u32 %s3583_s8, 6  ;;  %s3196_s10 = smov 104  }
  0xfc   : > { %s844_s19 = scalar_lea.vmem %s4065_s4, %s2499_s5  ;;  %s3669_s5 = sshll.u32 %s3166_s27, 1 }
  0xfd   : > { %v2844_v3 = vld [vmem:[%s844_s19] sm:$0xff]   ;;  %v2845_v4 = vld [vmem:[%s844_s19 + $0x8] sm:$0xff]   ;;  %2554 = vmatpush3.bf16.msra.mxu1 %v2843_v2  ;;  %p849_p0 = scmp.lt.s32.totalorder %s3669_s5, 3  ;;  %s3194_s27 = smov 120  }
  0xfe   : > { %2555 = vmatprep.mubr.msk.bf16.mxu1 %vm916_vm1, %v2844_v3  ;;  %v2846_v5 = vld [vmem:[%s4066_s14] sm:$0xff]   ;;  %v2847_v6 = vld [vmem:[%s4066_s14 + $0x8] sm:$0xff]   ;;  %2559 = vmatprep.subr.bf16.mxu1 %v2849_v8  ;;  %s3701_s21 = scalar_lea.vmem [#allocation14], %s2430_s13  ;;  %s4068_s2 = sld [smem:[#allocation36_spill]] }
  0xff   : > { %2568 = vmatpush3.bf16.msra.mxu0 %v2846_v5  ;;  %s850_s16 = scalar_select %p849_p0, %s3669_s5, 3 }
 0x100   : > { %2569 = vmatprep.subr.bf16.mxu0 %v3192_v0  ;;  %2556 = vmatmul.mubr.msk.bf16.vlgmr.msra.gmra.mrb[0].mxu1 %vm916_vm1, %v2845_v4  ;;  %s4069_s30 = sld [smem:[#allocation29_spill]]  ;;  %s4072_s24 = sld [smem:[#allocation41_spill]] }
 0x101   : > { %2560 = vmatpush3.bf16.msra.mxu1 %v2849_v8  ;;  %2563 = vmatprep.mubr.msk.bf16.mxu1 %vm916_vm1, %v2844_v3  ;;  %s3674_s4 = sadd.s32 %s2434_s17, %s850_s16  ;;  %s2492_s16 = sshll.u32 %s3170_s3, 2 }
 0x102   : > { %2561 = vmatprep.subr.bf16.mxu1 %v2850_v9  ;;  %s2435_s19 = sshll.u32 %s3674_s4, 3  ;;  %s4074_s4 = sld [smem:[#allocation40_spill]] }
 0x103   : > { %2570 = vmatpush3.bf16.msra.mxu0 %v2847_v6  ;;  %s864_s1 = scalar_lea.vmem %s4067_s7, %s2435_s19  ;;  %s2121_s17 = scalar_lea.sflag [#allocation4], %s3583_s8 }
 0x104   : > { %2583 = vmatprep.subr.bf16.mxu0 %v3192_v0  ;;  %v877_v44 = vld [vmem:[%s864_s1] sm:$0xff]  ;;  %v878_v45 = vld [vmem:[%s864_s1 + $0x8] sm:$0xff]  ;;  %p4079_p5 = scmp.ne.s32.totalorder %s4059_s20, 0 }
 0x105   : > { %2562 = vmatpush3.bf16.msra.mxu1 %v2850_v9  ;;  %vm879_vm3 = vcmp.gt.f32.partialorder %v877_v44, 0.5  ;;  %vm880_vm4 = vcmp.gt.f32.partialorder %v878_v45, 0.5 }
 0x106   : > { %2572 = vmatmul.mubr.msk.bf16.vlgmr.msra.gmra.mrb[0].mxu0 %vm916_vm1, %v3627_v7  ;;  %2575 = vmatprep.subr.bf16.mxu1 %v3192_v0  ;;  %v3683_v46 = vsel %vm879_vm3, -1e+30, %v3192_v0  ;;  %v3686_v48 = vsel %vm880_vm4, -1e+30, %v3192_v0  ;;  %s854_s23 = scalar_lea.vmem %s4069_s30, %s2435_s19  ;;  %s4073_s30 = sld [smem:[#allocation37_spill]] }
 0x107   : > { %2587 = vmatprep.mubr.msk.bf16.mxu0 %vm3193_vm0, %v3192_v0 }
 0x108   : > { %2564 = vmatmul.mubr.msk.bf16.vlgmr.msra.gmra.mrb[4].mxu1 %vm916_vm1, %v2845_v4 }
 0x109   : > { %2579 = vmatprep.mubr.msk.bf16.mxu1 %vm3193_vm0, %v3192_v0 }
 0x1d3   : > { %v2557_v10 = vpop.f32.mrb[0].mxu1 }
 0x1d4   : > { %v957_v12 = vpop.f32.mrb[1].mxu1  ;;  %v966_v15 = vadd.f32 %v2557_v10, %v2439_v11 }
 0x1d5   : > { %v2558_v14 = vpop.f32.mrb[2].mxu1  ;;  %v958_v19 = vadd.f32 %v2439_v11, %v957_v12 }
 0x1d6   : > { %v969_v16 = vadd.f32 %v2558_v14, %v2439_v11  ;;  %v960_v17 = vpop.f32.mrb[3].mxu1 }
 0x1d7   : > { %v961_v20 = vadd.f32 %v2439_v11, %v960_v17 }
 0x1d8   : > { %v3641_v23 = vpack.c.bf16 %v969_v16, %v966_v15  ;;  %v1244_v16 = vld [vmem:[#allocation10] sm:$0xf] }
 0x1d9   : > { %v1109_v18 = vpop.f32.mrb[0].mxu0  ;;  %v3643_v25 = vpack.c.bf16 %v961_v20, %v958_v19  ;;  %v1436_v17 = vsel %vm1387_vm5, %v1244_v16, 0 }
 0x1da   : > { %v1110_v21 = vadd.f32 %v2451_v13, %v1109_v18  ;;  %v2573_v22 = vpop.f32.mrb[1].mxu0  ;;  %v1131_v43 = vsel %vm1123_vm2, %v3641_v23, 0 }
 0x1db   : > { %v1112_v24 = vpop.f32.mrb[2].mxu0  ;;  %v1128_v30 = vsel %vm1123_vm2, %v3643_v25, 0  ;;  %v2565_v32 = vpop.f32.mrb[4].mxu1 }
 0x1dc   : > { %v1116_v26 = vmul.f32 0.35355338, %v1110_v21  ;;  %v1113_v27 = vadd.f32 %v2451_v13, %v1112_v24  ;;  %v2574_v28 = vpop.f32.mrb[3].mxu0  ;;  %2576 = vmatpush3.bf16.xpose.msra.mxu1 %v1128_v30  ;;  %v1038_v33 = vadd.f32 %v2565_v32, %v2446_v29  ;;  %v1029_v34 = vpop.f32.mrb[5].mxu1 }
 0x1dd   : > { %2577 = vmatprep.subr.bf16.mxu1 %v3192_v0  ;;  %v1030_v36 = vadd.f32 %v2446_v29, %v1029_v34  ;;  %v2566_v37 = vpop.f32.mrb[6].mxu1 }
 0x1de   : > { %v1117_v31 = vmul.f32 0.35355338, %v1113_v27  ;;  %v1041_v38 = vadd.f32 %v2566_v37, %v2446_v29  ;;  %v1032_v39 = vpop.f32.mrb[7].mxu1 }
 0x1df   : > { %v1033_v40 = vadd.f32 %v2446_v29, %v1032_v39 }
 0x1e0   : > { %v3650_v35 = vpack.c.bf16 %v1117_v31, %v1116_v26  ;;  %v3653_v41 = vpack.c.bf16 %v1041_v38, %v1038_v33 }
 0x1e1   : > { %v3655_v42 = vpack.c.bf16 %v1033_v40, %v1030_v36 }
 0x1e3   : > { %2584 = vmatpush3.bf16.msra.mxu0 %v3655_v42 }
 0x1e4   : > { %2578 = vmatpush3.bf16.xpose.msra.mxu1 %v1131_v43  ;;  %2585 = vmatprep.subr.bf16.mxu0 %v3192_v0 }
 0x1e5   : > { %2599 = vmatprep.subr.bf16.mxu1 %v3192_v0 }
 0x1e7   : > { %2586 = vmatpush3.bf16.msra.mxu0 %v3653_v41 }
 0x1e8   : > { %2591 = vmatprep.subr.bf16.mxu0 %v3192_v0 }
 0x1eb   : > { %2580 = vmatmul.mubr.msk.bf16.vlgmr.msra.gmra.mrb[8].mxu1 %vm1123_vm2, %v3650_v35 }
 0x1ec   : > { %2603 = vmatprep.mubr.msk.bf16.mxu1 %vm3193_vm0, %v3192_v0 }
 0x2be   : > { %v1167_v47 = vpop.f32.mrb[8].mxu1 }
 0x2bf   : > { %v1168_v49 = vadd.f32 %v1167_v47, %v3683_v46  ;;  %v2581_v50 = vpop.f32.mrb[9].mxu1 }
 0x2c0   : > { %v1170_v51 = vpop.f32.mrb[10].mxu1 }
 0x2c1   : > { %v1171_v52 = vadd.f32 %v1170_v51, %v3686_v48  ;;  %v2582_v53 = vpop.f32.mrb[11].mxu1  ;;  %v1174_v54 = vsel %vm916_vm1, %v1168_v49, -inf }
 0x2c2   : > { %1175 = vmax.xlane.f32.xlu0 %v1174_v54 }
 0x2c3   : > { %v1177_v55 = vsel %vm916_vm1, %v1171_v52, -inf }
 0x2c6   : > { %1178 = vmax.xlane.f32.xlu0 %v1177_v55 }
 0x2dc   : > { %1250 = vrot.lane.b32.xlu0 %v3643_v25, %s3194_s27 }
 0x34f   : > { %v1176_v56 = vpop.xlane.xlu0 %1175 }
 0x350   : > { %v1180_v57 = vsub.f32 %v1168_v49, %v1176_v56 }
 0x352   : > { %v1182_v58 = vmul.f32 1.442695, %v1180_v57  ;;  %v1383_v57 = vld [vmem:[#allocation10 + $0x4] sm:$0xf] }
 0x353   : > { %v1179_v59 = vpop.xlane.xlu0 %1178 }
 0x354   : > { %2858 = vpow2.f32 %v1182_v58  ;;  %v1181_v60 = vsub.f32 %v1171_v52, %v1179_v59  ;;  %v1389_v59 = vsel %vm1387_vm5, %v1383_v57, 0 }
 0x356   : > { %v1184_v61 = vmul.f32 1.442695, %v1181_v60 }
 0x357   : > { %v1251_v10 = vpop.permute.xlu0 %1250 }
 0x358   : > { %2860 = vpow2.f32 %v1184_v61  ;;  %v1258_v12 = vsel %vm1123_vm2, %v1251_v10, 0 }
 0x35e   : > { %v2859_v62 = vpop.eup %2858 }
 0x35f   : > { %v1186_v63 = vsel %vm916_vm1, %v2859_v62, 0.0 }
 0x360   : > { %1187 = vadd.xlane.f32.xlu1 %v1186_v63 }
 0x362   : > { %v2861_v1 = vpop.eup %2860 }
 0x363   : > { %v1189_v2 = vsel %vm916_vm1, %v2861_v1, 0.0 }
 0x364   : > { %1190 = vadd.xlane.f32.xlu1 %v1189_v2 }
 0x375   : > { %1252 = vrot.lane.b32.xlu1 %v3641_v23, %s3194_s27 }
 0x379   : > { %1246 = vrot.lane.b32.xlu1 %v3650_v35, %s3194_s27 }
 0x3ed   : > { %v1188_v3 = vpop.xlane.xlu1 %1187 }
 0x3ee   : > { %2862 = vrcp.f32 %v1188_v3 }
 0x3f1   : > { %v1191_v4 = vpop.xlane.xlu1 %1190 }
 0x3f2   : > { %2864 = vrcp.f32 %v1191_v4 }
 0x3f5   : > { %v1253_v13 = vpop.permute.xlu1 %1252 }
 0x3f6   : > { %v1261_v14 = vsel %vm1123_vm2, %v1253_v13, 0 }
 0x3f8   : > { %v2863_v5 = vpop.eup %2862 }
 0x3f9   : > { %v1194_v6 = vmul.f32 %v2863_v5, %v2859_v62  ;;  %v1247_v15 = vpop.permute.xlu1 %1246 }
 0x3fb   : > { %1196 = vst.msk [vmem:[%s3701_s21] sm:$0xff] %vm916_vm1, %v1194_v6 }
 0x3fc   : > { %v2865_v8 = vpop.eup %2864 }
 0x3fd   : > { %v1195_v9 = vmul.f32 %v2865_v8, %v2861_v1 }
 0x3ff   : > { %1197 = vst.msk [vmem:[%s3701_s21 + $0x8] sm:$0xff] %vm916_vm1, %v1195_v9  ;;  %v1198_v11 = vpack.c.bf16 %v1195_v9, %v1194_v6 }
 0x401   : > { %2588 = vmatmul.mubr.msk.bf16.vlgmr.msra.gmra.mrb[4].mxu0 %vm916_vm1, %v1198_v11 }
 0x402   : > { %2592 = vmatpush3.bf16.xpose.msra.mxu0 %v1258_v12  ;;  %2595 = vmatprep.mubr.msk.bf16.mxu0 %vm3193_vm0, %v3192_v0 }
 0x403   : > { %2593 = vmatprep.subr.bf16.mxu0 %v3192_v0 }
 0x40a   : > { %2594 = vmatpush3.bf16.xpose.msra.mxu0 %v1261_v14 }
 0x40b   : > { %2613 = vmatprep.subr.bf16.mxu0 %v3192_v0 }
 0x411   : > { %2596 = vmatmul.mubr.msk.bf16.vlgmr.msra.gmra.mrb[8].mxu0 %vm1123_vm2, %v1247_v15 }
 0x412   : > { %2615 = vmatprep.mubr.msk.bf16.mxu0 %vm3193_vm0, %v3192_v0  ;;  %2614 = vmatpush3.bf16.msra.mxu0 %v1436_v17 }
 0x413   : > { %2627 = vmatprep.subr.bf16.mxu0 %v3192_v0 }
 0x4d4   : > { %v1236_v18 = vpop.f32.mrb[4].mxu0 }
 0x4d5   : > { %v2589_v19 = vpop.f32.mrb[5].mxu0 }
 0x4d6   : > { %v1239_v20 = vpop.f32.mrb[6].mxu0 }
 0x4d7   : > { %v1243_v21 = vpack.c.bf16 %v1239_v20, %v1236_v18  ;;  %v2590_v22 = vpop.f32.mrb[7].mxu0 }
 0x4d9   : > { %2616 = vmatmul.mubr.msk.bf16.vlgmr.msra.gmra.mrb[12].mxu0 %vm1123_vm2, %v1243_v21 }
 0x4da   : > { %2631 = vmatprep.mubr.msk.bf16.mxu0 %vm3193_vm0, %v3192_v0 }
 0x4e4   : > { %v1297_v24 = vpop.f32.mrb[8].mxu0 }
 0x4e5   : > { %v1298_v26 = vadd.f32 %v1297_v24, %v3683_v46  ;;  %v2597_v27 = vpop.f32.mrb[9].mxu0 }
 0x4e6   : > { %v1300_v28 = vpop.f32.mrb[10].mxu0 }
 0x4e7   : > { %v1301_v29 = vadd.f32 %v1300_v28, %v3686_v48  ;;  %v2598_v30 = vpop.f32.mrb[11].mxu0  ;;  %v1304_v31 = vsel %vm916_vm1, %v1298_v26, -inf }
 0x4e8   : > { %1305 = vmax.xlane.f32.xlu1 %v1304_v31 }
 0x4e9   : > { %v1307_v32 = vsel %vm916_vm1, %v1301_v29, -inf }
 0x4ea   : > { %1308 = vmax.xlane.f32.xlu0 %v1307_v32 }
 0x4f9   : > { %1332 = vrot.lane.b32.xlu1 %v3655_v42, %s3194_s27 }
 0x4fd   : > { %1481 = vrot.lane.b32.xlu1 %v3643_v25, %s3195_s15 }
 0x501   : > { %1483 = vrot.lane.b32.xlu1 %v3641_v23, %s3195_s15 }
 0x505   : > { %1479 = vrot.lane.b32.xlu1 %v3650_v35, %s3195_s15 }
 0x509   : > { %1666 = vrot.lane.b32.xlu1 %v3641_v23, %s3196_s10 }
 0x575   : > { %v1306_v33 = vpop.xlane.xlu1 %1305 }
 0x576   : > { %v1310_v34 = vsub.f32 %v1298_v26, %v1306_v33 }
 0x577   : > { %v1309_v36 = vpop.xlane.xlu0 %1308 }
 0x578   : > { %v1312_v37 = vmul.f32 1.442695, %v1310_v34  ;;  %v1311_v38 = vsub.f32 %v1301_v29, %v1309_v36 }
 0x579   : > { %v1333_v39 = vpop.permute.xlu1 %1332 }
 0x57a   : > { %2866 = vpow2.f32 %v1312_v37  ;;  %v1314_v40 = vmul.f32 1.442695, %v1311_v38  ;;  %2600 = vmatpush3.bf16.msra.mxu1 %v1333_v39 }
 0x57b   : > { %2601 = vmatprep.subr.bf16.mxu1 %v3192_v0 }
 0x57c   : > { %2868 = vpow2.f32 %v1314_v40 }
 0x57d   : > { %v1482_v62 = vpop.permute.xlu1 %1481 }
 0x57e   : > { %v1489_v3 = vsel %vm1123_vm2, %v1482_v62, 0 }
 0x581   : > { %v1484_v4 = vpop.permute.xlu1 %1483 }
 0x582   : > { %v1492_v5 = vsel %vm1123_vm2, %v1484_v4, 0 }
 0x584   : > { %v2867_v43 = vpop.eup %2866 }
 0x585   : > { %v1316_v44 = vsel %vm916_vm1, %v2867_v43, 0.0  ;;  %v1480_v8 = vpop.permute.xlu1 %1479 }
 0x586   : > { %v2869_v45 = vpop.eup %2868  ;;  %1317 = vadd.xlane.f32.xlu0 %v1316_v44 }
 0x587   : > { %v1319_v47 = vsel %vm916_vm1, %v2869_v45, 0.0 }
 0x589   : > { %v1667_v10 = vpop.permute.xlu1 %1666 }
 0x58a   : > { %1320 = vadd.xlane.f32.xlu0 %v1319_v47  ;;  %v1675_v11 = vsel %vm1123_vm2, %v1667_v10, 0 }
 0x5a0   : > { %1334 = vrot.lane.b32.xlu0 %v3653_v41, %s3194_s27  ;;  %s4070_s27 = sld [smem:[#allocation39_spill]] }
 0x5a4   : > { %1664 = vrot.lane.b32.xlu0 %v3643_v25, %s3196_s10 }
 0x5a6   : > { %s4071_s13 = smov %s4070_s27 }
 0x5a8   : > { %1662 = vrot.lane.b32.xlu0 %v3650_v35, %s3196_s10 }
 0x5ac   : > { %v1472_v23 = vpop.f32.mrb[12].mxu0 }
 0x5ad   : > { %v2617_v49 = vpop.f32.mrb[13].mxu0 }
 0x5ae   : > { %v1475_v50 = vpop.f32.mrb[14].mxu0 }
 0x5af   : > { %v2618_v51 = vpop.f32.mrb[15].mxu0 }
 0x613   : > { %v1318_v52 = vpop.xlane.xlu0 %1317 }
 0x614   : > { %2870 = vrcp.f32 %v1318_v52 }
 0x617   : > { %v1321_v53 = vpop.xlane.xlu0 %1320 }
 0x618   : > { %2872 = vrcp.f32 %v1321_v53 }
 0x61b   : > { %v1335_v54 = vpop.permute.xlu0 %1334 }
 0x61c   : > { %2602 = vmatpush3.bf16.msra.mxu1 %v1335_v54 }
 0x61d   : > { %2607 = vmatprep.subr.bf16.mxu1 %v3192_v0 }
 0x61e   : > { %v2871_v55 = vpop.eup %2870 }
 0x61f   : > { %v1324_v56 = vmul.f32 %v2871_v55, %v2867_v43  ;;  %v1665_v6 = vpop.permute.xlu0 %1664 }
 0x620   : > { %v1672_v9 = vsel %vm1123_vm2, %v1665_v6, 0 }
 0x621   : > { %2459 = vst.msk [vmem:[%s3701_s21 + $0x10] sm:$0xff] %vm916_vm1, %v1324_v56 }
 0x622   : > { %v2873_v25 = vpop.eup %2872 }
 0x623   : > { %v1325_v35 = vmul.f32 %v2873_v25, %v2869_v45  ;;  %v1663_v12 = vpop.permute.xlu0 %1662 }
 0x625   : > { %2460 = vst.msk [vmem:[%s3701_s21 + $0x18] sm:$0xff] %vm916_vm1, %v1325_v35  ;;  %v1329_v58 = vpack.c.bf16 %v1325_v35, %v1324_v56 }
 0x627   : > { %2604 = vmatmul.mubr.msk.bf16.vlgmr.msra.gmra.mrb[12].mxu1 %vm916_vm1, %v1329_v58 }
 0x628   : > { %2608 = vmatpush3.bf16.msra.mxu1 %v1389_v59  ;;  %2609 = vmatprep.mubr.msk.bf16.mxu1 %vm3193_vm0, %v3192_v0 }
 0x629   : > { %2619 = vmatprep.subr.bf16.mxu1 %v3192_v0 }
 0x6fa   : > { %v1375_v60 = vpop.f32.mrb[12].mxu1 }
 0x6fb   : > { %v2605_v61 = vpop.f32.mrb[13].mxu1 }
 0x6fc   : > { %v1378_v63 = vpop.f32.mrb[14].mxu1 }
 0x6fd   : > { %v1382_v1 = vpack.c.bf16 %v1378_v63, %v1375_v60  ;;  %v2606_v2 = vpop.f32.mrb[15].mxu1 }
 0x6ff   : > { %2610 = vmatmul.mubr.msk.bf16.vlgmr.msra.gmra.mrb[16].mxu1 %vm1123_vm2, %v1382_v1 }
 0x700   : > { %2620 = vmatpush3.bf16.xpose.msra.mxu1 %v1489_v3  ;;  %2623 = vmatprep.mubr.msk.bf16.mxu1 %vm3193_vm0, %v3192_v0 }
 0x701   : > { %2621 = vmatprep.subr.bf16.mxu1 %v3192_v0 }
 0x708   : > { %2622 = vmatpush3.bf16.xpose.msra.mxu1 %v1492_v5  ;;  %v1612_v5 = vld [vmem:[#allocation10 + $0x8] sm:$0xf] }
 0x709   : > { %2641 = vmatprep.subr.bf16.mxu1 %v3192_v0  ;;  %v1617_v6 = vsel %vm1387_vm5, %v1612_v5, 0 }
 0x70f   : > { %2624 = vmatmul.mubr.msk.bf16.vlgmr.msra.gmra.mrb[20].mxu1 %vm1123_vm2, %v1480_v8 }
 0x710   : > { %2642 = vmatpush3.bf16.xpose.msra.mxu1 %v1672_v9  ;;  %2645 = vmatprep.mubr.msk.bf16.mxu1 %vm3193_vm0, %v3192_v0 }
 0x711   : > { %2643 = vmatprep.subr.bf16.mxu1 %v3192_v0 }
 0x718   : > { %2644 = vmatpush3.bf16.xpose.msra.mxu1 %v1675_v11 }
 0x719   : > { %2663 = vmatprep.subr.bf16.mxu1 %v3192_v0 }
 0x71f   : > { %2646 = vmatmul.mubr.msk.bf16.vlgmr.msra.gmra.mrb[24].mxu1 %vm1123_vm2, %v1663_v12 }
 0x720   : > { %2667 = vmatprep.mubr.msk.bf16.mxu1 %vm3193_vm0, %v3192_v0 }
 0x7d2   : > { %v1425_v13 = vpop.f32.mrb[16].mxu1 }
 0x7d3   : > { %v3772_v14 = vadd.f32 %v1472_v23, %v1425_v13  ;;  %v2611_v15 = vpop.f32.mrb[17].mxu1 }
 0x7d4   : > { %v1428_v16 = vpop.f32.mrb[18].mxu1 }
 0x7d5   : > { %v3774_v17 = vadd.f32 %v1475_v50, %v1428_v16  ;;  %v2612_v18 = vpop.f32.mrb[19].mxu1 }
 0x7e2   : > { %v1528_v19 = vpop.f32.mrb[20].mxu1 }
 0x7e3   : > { %v1529_v20 = vadd.f32 %v1528_v19, %v3683_v46  ;;  %v2625_v21 = vpop.f32.mrb[21].mxu1 }
 0x7e4   : > { %v1531_v22 = vpop.f32.mrb[22].mxu1 }
 0x7e5   : > { %v1532_v24 = vadd.f32 %v1531_v22, %v3686_v48  ;;  %v2626_v26 = vpop.f32.mrb[23].mxu1  ;;  %v1535_v27 = vsel %vm916_vm1, %v1529_v20, -inf }
 0x7e6   : > { %1536 = vmax.xlane.f32.xlu1 %v1535_v27 }
 0x7e7   : > { %v1538_v28 = vsel %vm916_vm1, %v1532_v24, -inf }
 0x7e8   : > { %1539 = vmax.xlane.f32.xlu0 %v1538_v28 }
 0x7f2   : > { %v1711_v29 = vpop.f32.mrb[24].mxu1 }
 0x7f3   : > { %v2647_v30 = vpop.f32.mrb[25].mxu1  ;;  %v1712_v33 = vadd.f32 %v1711_v29, %v3683_v46 }
 0x7f4   : > { %v1714_v31 = vpop.f32.mrb[26].mxu1 }
 0x7f5   : > { %v2648_v32 = vpop.f32.mrb[27].mxu1  ;;  %v1718_v34 = vsel %vm916_vm1, %v1712_v33, -inf  ;;  %v1715_v53 = vadd.f32 %v1714_v31, %v3686_v48 }
 0x7f7   : > { %1561 = vrot.lane.b32.xlu1 %v3655_v42, %s3195_s15  ;;  %v1721_v55 = vsel %vm916_vm1, %v1715_v53, -inf }
 0x81b   : > { %1719 = vmax.xlane.f32.xlu1 %v1718_v34 }
 0x873   : > { %v1537_v36 = vpop.xlane.xlu1 %1536 }
 0x874   : > { %v1541_v37 = vsub.f32 %v1529_v20, %v1537_v36  ;;  %v1795_v20 = vld [vmem:[#allocation10 + $0xc] sm:$0xf] }
 0x875   : > { %v1540_v38 = vpop.xlane.xlu0 %1539  ;;  %v1800_v21 = vsel %vm1387_vm5, %v1795_v20, 0 }
 0x876   : > { %v1543_v39 = vmul.f32 1.442695, %v1541_v37  ;;  %v1542_v40 = vsub.f32 %v1532_v24, %v1540_v38 }
 0x877   : > { %v1562_v43 = vpop.permute.xlu1 %1561 }
 0x878   : > { %2874 = vpow2.f32 %v1543_v39  ;;  %v1545_v44 = vmul.f32 1.442695, %v1542_v40  ;;  %2628 = vmatpush3.bf16.msra.mxu0 %v1562_v43 }
 0x879   : > { %2629 = vmatprep.subr.bf16.mxu0 %v3192_v0 }
 0x87a   : > { %2876 = vpow2.f32 %v1545_v44 }
 0x882   : > { %v2875_v45 = vpop.eup %2874 }
 0x883   : > { %v1547_v47 = vsel %vm916_vm1, %v2875_v45, 0.0 }
 0x884   : > { %v2877_v23 = vpop.eup %2876  ;;  %1548 = vadd.xlane.f32.xlu0 %v1547_v47 }
 0x885   : > { %v1550_v46 = vsel %vm916_vm1, %v2877_v23, 0.0 }
 0x888   : > { %1551 = vadd.xlane.f32.xlu0 %v1550_v46 }
 0x89e   : > { %1563 = vrot.lane.b32.xlu0 %v3653_v41, %s3195_s15  ;;  %s3890_s15 = sadd.s32 %s2492_s16, %s3669_s5  ;;  %s4078_s5 = sld [smem:[#allocation45_spill]] }
 0x89f   : > { %s2493_s3 = sshll.u32 %s3890_s15, 7 }
 0x8a4   : > { %s3900_s16 = scalar_lea.hbm %s4078_s5, %s2493_s3 }
 0x8a8   : > { %v1720_v49 = vpop.xlane.xlu1 %1719 }
 0x8a9   : > { %v1724_v50 = vsub.f32 %v1712_v33, %v1720_v49 }
 0x8ab   : > { %v1726_v51 = vmul.f32 1.442695, %v1724_v50 }
 0x8ad   : > { %2878 = vpow2.f32 %v1726_v51  ;;  %v3197_v51 = vmov 0  }
 0x8ae   : > { %2840 = vset.pattern.permute.xlu1 %v3197_v51  ;;  %2841 = vset.pattern.permute.xlu0 %v3197_v51 }
 0x8b7   : > { %v2879_v52 = vpop.eup %2878 }
 0x8b8   : > { %v1730_v54 = vsel %vm916_vm1, %v2879_v52, 0.0 }
 0x8b9   : > { %1731 = vadd.xlane.f32.xlu1 %v1730_v54 }
 0x8bd   : > { %1722 = vmax.xlane.f32.xlu0 %v1721_v55 }
 0x8ca   : > { %1744 = vrot.lane.b32.xlu1 %v3655_v42, %s3196_s10 }
 0x911   : > { %v1549_v56 = vpop.xlane.xlu0 %1548 }
 0x912   : > { %2880 = vrcp.f32 %v1549_v56 }
 0x915   : > { %v1552_v25 = vpop.xlane.xlu0 %1551 }
 0x916   : > { %2882 = vrcp.f32 %v1552_v25 }
 0x919   : > { %v1564_v57 = vpop.permute.xlu0 %1563 }
 0x91a   : > { %2630 = vmatpush3.bf16.msra.mxu0 %v1564_v57 }
 0x91b   : > { %2635 = vmatprep.subr.bf16.mxu0 %v3192_v0 }
 0x91c   : > { %v2881_v35 = vpop.eup %2880 }
 0x91d   : > { %v1555_v48 = vmul.f32 %v2881_v35, %v2875_v45  ;;  %v1855_v45 = vunpack.c.h.bf16 %v3627_v7 }
 0x91f   : > { %2465 = vst.msk [vmem:[%s3701_s21 + $0x20] sm:$0xff] %vm916_vm1, %v1555_v48 }
 0x920   : > { %v2883_v58 = vpop.eup %2882 }
 0x921   : > { %v1556_v59 = vmul.f32 %v2883_v58, %v2877_v23  ;;  %v875_v58 = vld [vmem:[%s854_s23] sm:$0xff] }
 0x923   : > { %2466 = vst.msk [vmem:[%s3701_s21 + $0x28] sm:$0xff] %vm916_vm1, %v1556_v59  ;;  %v1560_v60 = vpack.c.bf16 %v1556_v59, %v1555_v48  ;;  %v2851_v59 = vld [vmem:[%s4070_s27] sm:$0xff]   ;;  %s4077_s27 = sld [smem:[#allocation44_spill]] }
 0x924   : > { %2664 = vmatpush3.bf16.msra.mxu1 %v2851_v59 }
 0x925   : > { %2632 = vmatmul.mubr.msk.bf16.vlgmr.msra.gmra.mrb[16].mxu0 %vm916_vm1, %v1560_v60  ;;  %v876_v60 = vld [vmem:[%s854_s23 + $0x8] sm:$0xff]  ;;  %2665 = vmatprep.subr.bf16.mxu1 %v3192_v0  ;;  %s4076_s23 = sld [smem:[#allocation43_spill]] }
 0x926   : > { %2637 = vmatprep.mubr.msk.bf16.mxu0 %vm3193_vm0, %v3192_v0  ;;  %2636 = vmatpush3.bf16.msra.mxu0 %v1617_v6 }
 0x927   : > { %2649 = vmatprep.subr.bf16.mxu0 %v3192_v0 }
 0x946   : > { %v1732_v42 = vpop.xlane.xlu1 %1731 }
 0x947   : > { %2884 = vrcp.f32 %v1732_v42  ;;  %v2852_v42 = vld [vmem:[%s4071_s13 + $0x8] sm:$0xff]  }
 0x948   : > { %2666 = vmatpush3.bf16.msra.mxu1 %v2852_v42  ;;  %v2487_v42 = vld [vmem:[%s4076_s23] ss:$0 sm:$0xff]  ;;  %s3198_s23 = smov [#allocation13]  }
 0x949   : > { %s3072_s7 = sshll.u32 %s3198_s23, 4  ;;  %s3073_s7 = int_to_ptr.vmem [resolvable:$false] %s3072_s7 }
 0x94a   : > { %v1723_v61 = vpop.xlane.xlu0 %1722  ;;  %v1745_v18 = vpop.permute.xlu1 %1744  ;;  %s3074_s1 = scalar_lea.vmem %s3073_s7, 512 }
 0x94b   : > { %v1725_v62 = vsub.f32 %v1715_v53, %v1723_v61  ;;  %v2853_v61 = vld [vmem:[%s4072_s24] sm:$0xff]  }
 0x94d   : > { %v1728_v63 = vmul.f32 1.442695, %v1725_v62  ;;  %v2854_v62 = vld [vmem:[%s4072_s24 + $0x8] sm:$0xff]  }
 0x94f   : > { %2886 = vpow2.f32 %v1728_v63 }
 0x951   : > { %v2885_v1 = vpop.eup %2884 }
 0x952   : > { %v1738_v2 = vmul.f32 %v2885_v1, %v2879_v52 }
 0x954   : > { %2470 = vst.msk [vmem:[%s3701_s21 + $0x30] sm:$0xff] %vm916_vm1, %v1738_v2 }
 0x959   : > { %v2887_v3 = vpop.eup %2886 }
 0x95a   : > { %v1733_v4 = vsel %vm916_vm1, %v2887_v3, 0.0 }
 0x95b   : > { %1734 = vadd.xlane.f32.xlu0 %v1733_v4 }
 0x971   : > { %1746 = vrot.lane.b32.xlu0 %v3653_v41, %s3196_s10  ;;  %s2429_s10 = sshll.u32 %s3583_s8, 4 }
 0x9e8   : > { %v1735_v8 = vpop.xlane.xlu0 %1734 }
 0x9e9   : > { %2888 = vrcp.f32 %v1735_v8  ;;  %v2475_v8 = vld [vmem:[%s4073_s30] ss:$0 sm:$0xff] }
 0x9ec   : > { %v1747_v41 = vpop.permute.xlu0 %1746 }
 0x9f3   : > { %v2889_v9 = vpop.eup %2888 }
 0x9f4   : > { %v1739_v10 = vmul.f32 %v2889_v9, %v2887_v3 }
 0x9f6   : > { %2471 = vst.msk [vmem:[%s3701_s21 + $0x38] sm:$0xff] %vm916_vm1, %v1739_v10  ;;  %v1743_v19 = vpack.c.bf16 %v1739_v10, %v1738_v2 }
 0x9f8   : > { %v1604_v11 = vpop.f32.mrb[16].mxu0 }
 0x9f9   : > { %v2633_v12 = vpop.f32.mrb[17].mxu0 }
 0x9fa   : > { %v1607_v13 = vpop.f32.mrb[18].mxu0 }
 0x9fb   : > { %v1611_v15 = vpack.c.bf16 %v1607_v13, %v1604_v11  ;;  %v2634_v16 = vpop.f32.mrb[19].mxu0  ;;  %v2476_v11 = vld [vmem:[#allocation11] ss:$0 sm:$0xff] }
 0x9fd   : > { %2638 = vmatmul.mubr.msk.bf16.vlgmr.msra.gmra.mrb[20].mxu0 %vm1123_vm2, %v1611_v15 }
 0x9fe   : > { %2650 = vmatpush3.bf16.msra.mxu0 %v1745_v18  ;;  %2653 = vmatprep.mubr.msk.bf16.mxu0 %vm3193_vm0, %v3192_v0 }
 0x9ff   : > { %2651 = vmatprep.subr.bf16.mxu0 %v3192_v0 }
 0xa02   : > { %2652 = vmatpush3.bf16.msra.mxu0 %v1747_v41 }
 0xa03   : > { %2657 = vmatprep.subr.bf16.mxu0 %v3192_v0 }
 0xa05   : > { %2654 = vmatmul.mubr.msk.bf16.vlgmr.msra.gmra.mrb[24].mxu0 %vm916_vm1, %v1743_v19 }
 0xa06   : > { %2659 = vmatprep.mubr.msk.bf16.mxu0 %vm3193_vm0, %v3192_v0  ;;  %2658 = vmatpush3.bf16.msra.mxu0 %v1800_v21 }
 0xa07   : > { %2671 = vmatprep.subr.bf16.mxu0 %v3192_v0 }
 0xad0   : > { %v1653_v22 = vpop.f32.mrb[20].mxu0 }
 0xad1   : > { %v1660_v24 = vadd.f32 %v1653_v22, %v3772_v14  ;;  %v2639_v26 = vpop.f32.mrb[21].mxu0  ;;  %v2474_v14 = vld [vmem:[%s4068_s2] ss:$0 sm:$0xff]  ;;  %s4075_s2 = sld [smem:[#allocation42_spill]] }
 0xad2   : > { %v1656_v27 = vpop.f32.mrb[22].mxu0  ;;  %v2856_v26 = vld [vmem:[%s4072_s24 + $0x18] sm:$0xff]  }
 0xad3   : > { %v1661_v28 = vadd.f32 %v1656_v27, %v3774_v17  ;;  %v2640_v29 = vpop.f32.mrb[23].mxu0  ;;  %v1854_v17 = vunpack.c.l.bf16 %v3627_v7  ;;  %v2477_v27 = vld [vmem:[%s4074_s4] ss:$0 sm:$0xff]  ;;  %s832_s4 = scalar_lea.vmem [#allocation13], %s2429_s10 }
 0xad4   : > { %s2141_s12 = sshll.u32 %s832_s4, 4  ;;  %s3904_s12 = int_to_ptr.vmem [resolvable:$true] %s2141_s12 }
 0xad5   : > { %s3068_s30 = scalar_lea.vmem %s3904_s12, 256  ;;  %p3075_p4 = scmp.lt.s32.totalorder %s3904_s12, %s3073_s7 }
 0xad6   : > { %p3069_p7 = scmp.ne.s32.totalorder %s3904_s12, %s3068_s30  ;;  %p3076_p6 = scmp.lt.s32.totalorder %s3074_s1, %s3068_s30 }
 0xad8   : > { %v1787_v30 = vpop.f32.mrb[24].mxu0  ;;  %p3070_p11 = pnand %p3069_p7, %p4079_p5  ;;  %p3077_p9 = por %p3076_p6, %p3075_p4 }
 0xad9   : > { %v2655_v31 = vpop.f32.mrb[25].mxu0 }
 0xada   : > { %v1790_v32 = vpop.f32.mrb[26].mxu0  ;;  %p3071_p2 = pneg %p3070_p11 }
 0xadb   : > { %v1794_v33 = vpack.c.bf16 %v1790_v32, %v1787_v30  ;;  %v2656_v34 = vpop.f32.mrb[27].mxu0 }
 0xadc   : > { %p3078_p1 = pnand %p3077_p9, %p3071_p2 }
 0xadd   : > { %2660 = vmatmul.mubr.msk.bf16.vlgmr.msra.gmra.mrb[28].mxu0 %vm1123_vm2, %v1794_v33 }
 0xade   : > { %2679 = vmatprep.mubr.msk.bf16.mxu0 %vm3193_vm0, %v3192_v0  ;;  %2672 = vmatpush3.bf16.msra.mxu0 %v2853_v61 }
 0xadf   : > { %2673 = vmatprep.subr.bf16.mxu0 %v3192_v0 }
 0xae2   : > { %2674 = vmatpush3.bf16.msra.mxu0 %v2854_v62  ;;  %v2488_v62 = vld [vmem:[%s4077_s27] ss:$0 sm:$0xff] }
 0xae3   : > { %2675 = vmatprep.subr.bf16.mxu0 %v3192_v0 }
 0xbb0   : > { %v1836_v36 = vpop.f32.mrb[28].mxu0 }
 0xbb1   : > { %v1843_v37 = vadd.f32 %v1836_v36, %v1660_v24  ;;  %v2661_v38 = vpop.f32.mrb[29].mxu0  ;;  %v2855_v24 = vld [vmem:[%s4072_s24 + $0x10] sm:$0xff]  }
 0xbb2   : > { %v1839_v39 = vpop.f32.mrb[30].mxu0  ;;  %2676 = vmatpush3.bf16.msra.mxu0 %v2855_v24 }
 0xbb3   : > { %v1852_v40 = vadd.f32 %v2474_v14, %v1843_v37  ;;  %v1844_v43 = vadd.f32 %v1839_v39, %v1661_v28  ;;  %v2662_v44 = vpop.f32.mrb[31].mxu0  ;;  %2677 = vmatprep.subr.bf16.mxu0 %v3192_v0  ;;  %v2481_v0 = vld [vmem:[%s4075_s2] ss:$0 sm:$0xff] }
 0xbb5   : > { %v1853_v47 = vadd.f32 %v2474_v14, %v1844_v43  ;;  %v1856_v23 = vadd.f32 %v1854_v17, %v1852_v40 }
 0xbb6   : > { %2678 = vmatpush3.bf16.msra.mxu0 %v2856_v26 }
 0xbb7   : > { %v1858_v46 = vsel %vm916_vm1, %v1856_v23, 0.0  ;;  %v1857_v49 = vadd.f32 %v1855_v45, %v1853_v47 }
 0xbb8   : > { %1859 = vadd.xlane.f32.xlu1 %v1858_v46 }
 0xbb9   : > { %v1861_v50 = vsel %vm916_vm1, %v1857_v49, 0.0 }
 0xbba   : > { %1862 = vadd.xlane.f32.xlu0 %v1861_v50 }
 0xc45   : > { %v1860_v52 = vpop.xlane.xlu1 %1859 }
 0xc46   : > { %v1865_v53 = vmul.f32 0.03125, %v1860_v52 }
 0xc47   : > { %v1863_v54 = vpop.xlane.xlu0 %1862 }
 0xc48   : > { %v1867_v55 = vsub.f32 %v1856_v23, %v1865_v53  ;;  %v1866_v56 = vmul.f32 0.03125, %v1863_v54 }
 0xc4a   : > { %v1868_v25 = vsub.f32 %v1857_v49, %v1866_v56  ;;  %v1869_v7 = vmul.f32 %v1867_v55, %v1867_v55 }
 0xc4c   : > { %v1871_v57 = vsel %vm916_vm1, %v1869_v7, 0.0  ;;  %v1870_v35 = vmul.f32 %v1868_v25, %v1868_v25 }
 0xc4d   : > { %1872 = vadd.xlane.f32.xlu1 %v1871_v57 }
 0xc4e   : > { %v1874_v48 = vsel %vm916_vm1, %v1870_v35, 0.0 }
 0xc4f   : > { %1875 = vadd.xlane.f32.xlu0 %v1874_v48 }
 0xc5e   : > { %1905 = vperm.xlu1 %2840, %v875_v58  }
 0xc65   : > { %1910 = vperm.xlu0 %2841, %v876_v60  }
 0xcda   : > { %v1873_v63 = vpop.xlane.xlu1 %1872 }
 0xcdb   : > { %v1877_v1 = vmul.f32 0.03125, %v1873_v63 }
 0xcdc   : > { %v1876_v2 = vpop.xlane.xlu0 %1875 }
 0xcdd   : > { %v1879_v3 = vadd.f32 1e-05, %v1877_v1  ;;  %v1878_v4 = vmul.f32 0.03125, %v1876_v2 }
 0xcde   : > { %v3858_v18 = vpop.permute.xlu1 %1905 }
 0xcdf   : > { %2890 = vrsqrt.f32 %v1879_v3  ;;  %v1880_v5 = vadd.f32 1e-05, %v1878_v4 }
 0xce1   : > { %2892 = vrsqrt.f32 %v1880_v5 }
 0xce4   : > { %v3860_v41 = vpop.permute.xlu0 %1910 }
 0xce9   : > { %v2891_v6 = vpop.eup %2890 }
 0xcea   : > { %v1883_v9 = vmul.f32 %v2891_v6, %v1867_v55 }
 0xceb   : > { %v2893_v10 = vpop.eup %2892 }
 0xcec   : > { %v1892_v12 = vmul.f32 %v2475_v8, %v1883_v9  ;;  %v1884_v13 = vmul.f32 %v2893_v10, %v1868_v25 }
 0xcee   : > { %v1901_v15 = vadd.f32 %v2476_v11, %v1892_v12  ;;  %v1893_v16 = vmul.f32 %v2475_v8, %v1884_v13 }
 0xcf0   : > { %v1902_v19 = vadd.f32 %v2476_v11, %v1893_v16  ;;  %v1913_v20 = vmul.f32 %v3858_v18, %v1901_v15 }
 0xcf2   : > { %v1914_v21 = vmul.f32 %v3860_v41, %v1902_v19 }
 0xcf4   : > { %v1915_v22 = vpack.c.bf16 %v1914_v21, %v1913_v20 }
 0xcf6   : > { %2668 = vmatmul.mubr.msk.bf16.vlgmr.msra.gmra.mrb[28].mxu1 %vm916_vm1, %v1915_v22 }
 0xdc9   : > { %v1976_v28 = vpop.f32.mrb[28].mxu1 }
 0xdca   : > { %v1977_v29 = vadd.f32 %v2477_v27, %v1976_v28  ;;  %v2669_v30 = vpop.f32.mrb[29].mxu1 }
 0xdcb   : > { %v1979_v31 = vpop.f32.mrb[30].mxu1 }
 0xdcc   : > { %v1980_v32 = vadd.f32 %v2477_v27, %v1979_v31  ;;  %v2670_v33 = vpop.f32.mrb[31].mxu1  ;;  %v1983_v34 = vmax.f32 %v1977_v29, 0.0 }
 0xdce   : > { %v1984_v36 = vmax.f32 %v1980_v32, 0.0 }
 0xdd0   : > { %v1985_v14 = vpack.c.bf16 %v1984_v36, %v1983_v34 }
 0xdd2   : > { %2680 = vmatmul.mubr.msk.bf16.vlgmr.msra.gmra.mrb[32].mxu0 %vm2025_vm6, %v1985_v14 }
 0xea5   : > { %v2063_v37 = vpop.f32.mrb[32].mxu0 }
 0xea6   : > { %v2064_v38 = vadd.f32 %v2481_v0, %v2063_v37  ;;  %v2681_v17 = vpop.f32.mrb[33].mxu0 }
 0xea7   : > { %v2066_v39 = vpop.f32.mrb[34].mxu0 }
 0xea8   : > { %v2067_v40 = vadd.f32 %v2481_v0, %v2066_v39  ;;  %v2682_v43 = vpop.f32.mrb[35].mxu0  ;;  %v2070_v44 = vadd.f32 %v2064_v38, %v1913_v20 }
 0xeaa   : > { %v2072_v45 = vsel %vm916_vm1, %v2070_v44, 0.0  ;;  %v2071_v47 = vadd.f32 %v2067_v40, %v1914_v21 }
 0xeab   : > { %2073 = vadd.xlane.f32.xlu1 %v2072_v45 }
 0xeac   : > { %v2075_v23 = vsel %vm916_vm1, %v2071_v47, 0.0 }
 0xead   : > { %2076 = vadd.xlane.f32.xlu0 %v2075_v23 }
 0xf38   : > { %v2074_v46 = vpop.xlane.xlu1 %2073 }
 0xf39   : > { %v2078_v49 = vmul.f32 0.03125, %v2074_v46 }
 0xf3a   : > { %v2077_v50 = vpop.xlane.xlu0 %2076 }
 0xf3b   : > { %v2080_v51 = vsub.f32 %v2070_v44, %v2078_v49  ;;  %v2079_v52 = vmul.f32 0.03125, %v2077_v50 }
 0xf3d   : > { %v2081_v53 = vsub.f32 %v2071_v47, %v2079_v52  ;;  %v2082_v54 = vmul.f32 %v2080_v51, %v2080_v51 }
 0xf3f   : > { %v2084_v55 = vsel %vm916_vm1, %v2082_v54, 0.0  ;;  %v2083_v56 = vmul.f32 %v2081_v53, %v2081_v53 }
 0xf40   : > { %2085 = vadd.xlane.f32.xlu1 %v2084_v55 }
 0xf41   : > { %v2087_v25 = vsel %vm916_vm1, %v2083_v56, 0.0 }
 0xf44   : > { %2088 = vadd.xlane.f32.xlu1 %v2087_v25 }
 0xfcd   : > { %v2086_v7 = vpop.xlane.xlu1 %2085 }
 0xfce   : > { %v2090_v57 = vmul.f32 0.03125, %v2086_v7 }
 0xfd0   : > { %v2092_v35 = vadd.f32 1e-05, %v2090_v57 }
 0xfd1   : > { %v2089_v48 = vpop.xlane.xlu1 %2088 }
 0xfd2   : > { %2894 = vrsqrt.f32 %v2092_v35  ;;  %v2091_v58 = vmul.f32 0.03125, %v2089_v48 }
 0xfd4   : > { %v2093_v59 = vadd.f32 1e-05, %v2091_v58 }
 0xfd6   : > { %2896 = vrsqrt.f32 %v2093_v59 }
 0xfdc   : > { %v2895_v60 = vpop.eup %2894 }
 0xfdd   : > { %v2096_v61 = vmul.f32 %v2895_v60, %v2080_v51 }
 0xfdf   : > { %v2105_v63 = vmul.f32 %v2487_v42, %v2096_v61 }
 0xfe0   : > { %v2897_v1 = vpop.eup %2896 }
 0xfe1   : > { %v2114_v2 = vadd.f32 %v2488_v62, %v2105_v63  ;;  %v2097_v3 = vmul.f32 %v2897_v1, %v2081_v53 }
 0xfe3   : > { %v2116_v4 = vmul.f32 %v2114_v2, %v3858_v18  ;;  %v2106_v5 = vmul.f32 %v2487_v42, %v2097_v3 }
 0xfe5   : > { %v2115_v6 = vadd.f32 %v2488_v62, %v2106_v5  ;;  %2118 = vst.msk [vmem:[%s832_s4] sm:$0xff] %vm916_vm1, %v2116_v4 }
 0xfe7   : > { %v2117_v8 = vmul.f32 %v2115_v6, %v3860_v41 }
 0xfe9   : > { %2119 = vst.msk [vmem:[%s832_s4 + $0x8] sm:$0xff] %vm916_vm1, %v2117_v8 }
 0xfea   : > { %3081 = shalt.err (!%p3078_p1)
}
 0xfeb   : > { %s3082_s27 = scalar_lea.hbm %s3900_s16, 256  ;;  %s3086_s19 = scalar_lea.hbm %s4078_s5, 1024 }
 0xfec   : > { %p3083_p3 = scmp.ne.s32.totalorder %s3900_s16, %s3082_s27  ;;  %p3087_p13 = scmp.lt.u32.totalorder %s3900_s16, %s4078_s5 }
 0xfed   : > { %p3088_p12 = scmp.lt.u32.totalorder %s3086_s19, %s3082_s27  ;;  %p3090_p7 = scmp.lt.u32.totalorder %s3082_s27, %s3900_s16 }
 0xfee   : > { %p3084_p10 = pnand %p3083_p3, %p4079_p5 }
 0xfef   : > { %p3089_p0 = por %p3088_p12, %p3087_p13 }
 0xff0   : > { %p3085_p8 = pneg %p3084_p10 }
 0xff1   : > { %p3091_p11 = por %p3090_p7, %p3089_p0 }
 0xff3   : > { %p3092_p2 = pnand %p3091_p11, %p3085_p8 }
 0xff5   : > { %3095 = shalt.err (!%p3092_p2)
}
 0xff6   : > { %s3199_s30 = smov 128   ;;  %s3200_s7 = smov 8  }
 0xff7   : > { %2705 = dma.vmem_to_hbm [thread:$0]  (%p4079_p5), %s3904_s12, 256, %s3900_s16, %s2121_s17, %s3199_s30, %s3199_s30, %s3200_s7  }
 0xff8   : > { %s2126_s1 = scalar_lea.sflag [#allocation15], %s3583_s8 }
 0xff9   : > { %s4080_s19 = sld [smem:[#allocation46_spill]]  ;;  %s2175_s2 = sshll.u32 %s3701_s21, 4  ;;  %s2176_s2 = int_to_ptr.vmem [resolvable:$true] %s2175_s2 }
 0xffa   : > { %s3201_s23 = smov 256   ;;  %s3202_s8 = smov 1024  }
 0xffb   : > { %2706 = sst [smem:[#allocation17]] (%p4079_p5), %s3201_s23  ;;  %s3203_s15 = smov 2  }
 0xffc   : > { %2707 = sst [smem:[#allocation17 + $0x1]] (%p4079_p5), %s3202_s8  ;;  %s3204_s12 = smov 128  }
 0xffd   : > { %2708 = sst [smem:[#allocation17 + $0x2]] (%p4079_p5), %s3203_s15  ;;  %s3205_s16 = smov 8  }
 0xffe   : > { %2709 = sst [smem:[#allocation17 + $0x3]] (%p4079_p5), %s3204_s12  ;;  %s3207_s21 = smov 0  }
 0xfff   : > { %s2158_s27 = scalar_lea.hbm %s4080_s19, %s2493_s3  ;;  %2710 = sst [smem:[#allocation17 + $0x4]] (%p4079_p5), %s3204_s12 }
0x1000   : > { %2711 = sst [smem:[#allocation17 + $0x5]] (%p4079_p5), %s3205_s16  ;;  %s3206_s3 = smov [#allocation16]  }
0x1001   : > { %2712 = dma.general (%p4079_p5), %s2176_s2, 1024, %s2158_s27, %s2126_s1, %s3206_s3, [#allocation17], %s3207_s21, 0  }
0x1002 PF: > { %s4081_s17 = sld [smem:[#allocation24_spill]]  ;;  %p2753_p4 = scmp.ge.s32.totalorder %s3182_s0, 2 }
0x1003   : > { %p4082_p6 = scmp.ne.s32.totalorder %s4060_s22, 0 }
0x1005   : > { %p2736_p9 = pnand %p2753_p4, %p4082_p6 }
0x1008   : > { %s2203_s30 = sand.u32 1, %s4081_s17  }
0x1009   : > { %s2204_s7 = scalar_lea.sflag [#allocation4], %s2203_s30 }
0x100a   : > { %3145 = dma.done.wait (!%p2736_p9), %s2204_s7, 256  }
0x100b   : > { %3147 = vsyncadd (!%p2736_p9), %s2204_s7, 4294967040  ;;  %s2213_s10 = scalar_lea.sflag [#allocation15], %s2203_s30 }
0x100c   : > { %3149 = dma.done.wait (!%p2736_p9), %s2213_s10, 1024  }
0x100d   : > { %3151 = vsyncadd (!%p2736_p9), %s2213_s10, 4294966272  ;;  %s44_s0 = sadd.s32 1, %s3182_s0   ;;  %s4083_s20 = sld [smem:[#allocation25_spill]] }
0x100e   : > { %p41_p1 = scmp.ge.s32.totalorder %s44_s0, 6   ;;  %s4084_s1 = sld [smem:[#allocation26_spill]] }
0x100f   : > { %s4085_s2 = smov %s3158_s25  ;;  %s4086_s25 = smov %s3162_s26 }
0x1010   : > { %s4087_s26 = smov %s3532_s18  ;;  %s4088_s27 = smov %s3174_s28 }
0x1011   : > { %s4089_s3 = smov %s3178_s29  ;;  %43 = sbr.rel (!%p41_p1) target bundleno = 33 (0x21), region = 199 }
0x1013   : > { %s4090_s28 = smov %s4083_s20 }
0x1014   : > { %s4091_s29 = smov %s4084_s1 }
0x1018   :  { %2218 = vsyncpa [#allocation3], 1 }
0x1019   :  { %2220 = vsyncpa [#allocation3 + $0x1], 1 }
0x101a   :  { %2221 = vsyncpa [#allocation6], 1 }
0x101b   :  { %2222 = vsyncpa [#allocation9], 1 }
0x101c   :  { %2223 = vsyncpa [#allocation12], 1 }
0x101d   :  { %2224 = vsyncpa [#allocation4], 1 }
0x101e   :  { %2226 = vsyncpa [#allocation4 + $0x1], 1 }
0x101f   :  { %2227 = vsyncpa [#allocation15], 1 }
0x1020   :  { %2229 = vsyncpa [#allocation15 + $0x1], 1 }

</bundles_post_ra>
